<compile_context>
chip_gen: v6e
topology: v6e:2x2x1
jax: 0.10.0
libtpu: 0.0.40
codegen_flags: <defaults>
</compile_context>

<pallas_src>
import math

import jax
import jax.numpy as jnp
from jax import lax
from jax.experimental import pallas as pl
from jax.experimental.pallas import tpu as pltpu

# ----------------------------- small BERT config -----------------------------
VOCAB = 100      # synthetic vocab
MAX_POS = 16     # max position embeddings
H = 32           # hidden size
HEADS = 4
DH = H // HEADS  # head dim = 8
INTER = 128      # FFN intermediate (4*H)
LAYERS = 2
CLASSES = 2
N = 2            # batch
L = 8            # sequence length
NL = N * L       # merged token rows
R = HEADS * NL   # block-diagonal attention rows (head-major ordering: row = h*NL + b*L + i)
LN_EPS = 1e-12
ATTN_SCALE = 1.0 / math.sqrt(DH)
NEG_INF = -1e9   # additive mask for cross-(head,sequence) blocks


def _gelu(x):
    # TODO(synk): HF BERT uses exact erf-based GELU; tanh approx used for guaranteed Mosaic lowering.
    return 0.5 * x * (1.0 + jnp.tanh(jnp.sqrt(2.0 / jnp.pi) * (x + 0.044715 * x * x * x)))


def _layernorm(x, g, b):
    # Two independent reductions (E[x], E[x^2]) -> shorter dependency chain into rsqrt.
    mu = jnp.mean(x, axis=-1, keepdims=True)
    ms = jnp.mean(x * x, axis=-1, keepdims=True)
    var = jnp.maximum(ms - mu * mu, 0.0)
    return (x - mu) * lax.rsqrt(var + LN_EPS) * g + b


# ------------------------------ fused Pallas kernel ---------------------------
def _bert_kernel(x_ref, mask_ref,
                 embg_ref, embb_ref,
                 wqkv_ref, bqkv_ref, wo_ref, bo_ref, ln1g_ref, ln1b_ref,
                 w1_ref, b1_ref, w2_ref, b2_ref, ln2g_ref, ln2b_ref,
                 poolw_ref, poolb_ref, clsw_ref, clsb_ref,
                 out_ref,
                 xbd_ref, ctxcat_ref):
    f32, bf16 = jnp.float32, jnp.bfloat16

    x = _layernorm(x_ref[...], embg_ref[...], embb_ref[...])        # (NL, H) f32, whole batch
    mask = mask_ref[...]                                            # (R, R) block-diag additive

    # Off-diagonal blocks of the block-diagonal QKV operand stay zero for the whole kernel.
    xbd_ref[...] = jnp.zeros_like(xbd_ref)

    for li in range(LAYERS):                                        # static unroll, LAYERS=2
        # ---- fused head-major QKV: one MXU push for all heads & all sequences ----
        for h in range(HEADS):                                      # 4 diagonal-block stores
            xbd_ref[h * NL:(h + 1) * NL, h * H:(h + 1) * H] = x
        qkv = jnp.dot(xbd_ref[...].astype(bf16), wqkv_ref[li],
                      preferred_element_type=f32) + bqkv_ref[li]    # (R, 3*DH), scale pre-folded
        q = qkv[:, 0:DH].astype(bf16)                               # (R, DH) head-major rows
        k = qkv[:, DH:2 * DH].astype(bf16)
        v = qkv[:, 2 * DH:3 * DH].astype(bf16)

        # ---- block-diagonal attention: one score matmul, one softmax, one ctx matmul ----
        s = lax.dot_general(q, k, (((1,), (1,)), ((), ())),
                            preferred_element_type=f32) + mask      # (R, R)
        s = s - jnp.max(s, axis=-1, keepdims=True)
        e = jnp.exp(s)
        p = (e * pl.reciprocal(jnp.sum(e, axis=-1, keepdims=True), approx=True)).astype(bf16)
        ctx = jnp.dot(p, v, preferred_element_type=f32)             # (R, DH)

        # ---- head-major -> token-major repack, then a single Wo matmul ----
        for h in range(HEADS):
            ctxcat_ref[:, h * DH:(h + 1) * DH] = ctx[h * NL:(h + 1) * NL, :]
        attn = jnp.dot(ctxcat_ref[...].astype(bf16), wo_ref[li],
                       preferred_element_type=f32) + bo_ref[li]     # (NL, H)
        x = _layernorm(attn + x, ln1g_ref[li], ln1b_ref[li])

        # ---- FFN ----
        ff = _gelu(jnp.dot(x.astype(bf16), w1_ref[li],
                           preferred_element_type=f32) + b1_ref[li])
        ff = jnp.dot(ff.astype(bf16), w2_ref[li],
                     preferred_element_type=f32) + b2_ref[li]
        x = _layernorm(ff + x, ln2g_ref[li], ln2b_ref[li])

    # ---- pooler (dense + tanh) + classifier, fused tail; rows are independent so we compute
    # all NL rows in one push and store only the [CLS] rows (row b*L of each sequence). ----
    pooled = jnp.tanh(jnp.dot(x.astype(bf16), poolw_ref[...],
                              preferred_element_type=f32) + poolb_ref[...])
    logits = jnp.dot(pooled.astype(bf16), clsw_ref[...],
                     preferred_element_type=f32) + clsb_ref[...]    # (NL, CLASSES)
    for b in range(N):
        out_ref[b:b + 1, :] = logits[b * L:b * L + 1, :]


# ------------------------------ model assembly -------------------------------
def init_params(key):
    def w(k, shape):
        return jax.random.normal(k, shape, jnp.float32) * 0.02

    keys = jax.random.split(key, 5)

    layers = []
    for li in range(LAYERS):
        lk = jax.random.split(jax.random.fold_in(key, 100 + li), 6)
        layers.append(dict(
            wq=w(lk[0], (H, H)), bq=jnp.zeros((H,), jnp.float32),
            wk=w(lk[1], (H, H)), bk=jnp.zeros((H,), jnp.float32),
            wv=w(lk[2], (H, H)), bv=jnp.zeros((H,), jnp.float32),
            wo=w(lk[3], (H, H)), bo=jnp.zeros((H,), jnp.float32),
            ln1_g=jnp.ones((H,), jnp.float32), ln1_b=jnp.zeros((H,), jnp.float32),
            w1=w(lk[4], (H, INTER)), b1=jnp.zeros((INTER,), jnp.float32),
            w2=w(lk[5], (INTER, H)), b2=jnp.zeros((H,), jnp.float32),
            ln2_g=jnp.ones((H,), jnp.float32), ln2_b=jnp.zeros((H,), jnp.float32),
        ))

    def qkv_head_major(l):
        # Head-major fused QKV weight (HEADS*H, 3*DH) for the block-diagonal formulation;
        # the 1/sqrt(dh) attention scale is folded into the Q part (weight AND bias).
        wq_h = (l["wq"] * ATTN_SCALE).reshape(H, HEADS, DH).transpose(1, 0, 2)  # (HEADS, H, DH)
        wk_h = l["wk"].reshape(H, HEADS, DH).transpose(1, 0, 2)
        wv_h = l["wv"].reshape(H, HEADS, DH).transpose(1, 0, 2)
        w_hm = jnp.concatenate([wq_h, wk_h, wv_h], axis=-1).reshape(HEADS * H, 3 * DH)
        b_hm = jnp.concatenate([(l["bq"] * ATTN_SCALE).reshape(HEADS, DH),
                                l["bk"].reshape(HEADS, DH),
                                l["bv"].reshape(HEADS, DH)], axis=-1)           # (HEADS, 3*DH)
        b_hm = jnp.repeat(b_hm, NL, axis=0)                                     # (R, 3*DH)
        return w_hm, b_hm

    w_hm_list, b_hm_list = zip(*(qkv_head_major(l) for l in layers))
    bf16 = jnp.bfloat16

    # Stack per-layer weights along a leading layer axis; matmul operands in bf16
    # (f32 accumulation in-kernel), biases / LayerNorm params in f32.
    stacked = {
        "emb_ln_g": jnp.ones((1, H), jnp.float32),
        "emb_ln_b": jnp.zeros((1, H), jnp.float32),
        "wqkv": jnp.stack(w_hm_list).astype(bf16),               # (LAYERS, HEADS*H, 3*DH)
        "bqkv": jnp.stack(b_hm_list),                            # (LAYERS, R, 3*DH) f32
        "wo": jnp.stack([l["wo"] for l in layers]).astype(bf16),
        "bo": jnp.stack([l["bo"].reshape(1, H) for l in layers]),
        "ln1_g": jnp.stack([l["ln1_g"].reshape(1, H) for l in layers]),
        "ln1_b": jnp.stack([l["ln1_b"].reshape(1, H) for l in layers]),
        "w1": jnp.stack([l["w1"] for l in layers]).astype(bf16),
        "b1": jnp.stack([l["b1"].reshape(1, INTER) for l in layers]),
        "w2": jnp.stack([l["w2"] for l in layers]).astype(bf16),
        "b2": jnp.stack([l["b2"].reshape(1, H) for l in layers]),
        "ln2_g": jnp.stack([l["ln2_g"].reshape(1, H) for l in layers]),
        "ln2_b": jnp.stack([l["ln2_b"].reshape(1, H) for l in layers]),
        "pool_w": w(keys[3], (H, H)).astype(bf16),
        "pool_b": jnp.zeros((1, H), jnp.float32),
        "cls_w": w(keys[4], (H, CLASSES)).astype(bf16),
        "cls_b": jnp.zeros((1, CLASSES), jnp.float32),
    }

    return {
        "word_emb": w(keys[0], (VOCAB, H)),
        "pos_emb": w(keys[1], (MAX_POS, H)),
        "type_emb": w(keys[2], (2, H)),
        "stacked": stacked,
    }


def bert_sequence_classifier(params, input_ids, attention_mask=None):
    """input_ids: [N, L] int32, attention_mask: [N, L] -> logits [N, CLASSES]."""
    if attention_mask is None:
        attention_mask = jnp.ones((N, L), jnp.int32)

    # Embedding gather + sum is glue in JAX (data-dependent gather); merge batch & seq rows.
    we = params["word_emb"][input_ids]                       # (N, L, H)
    pe = params["pos_emb"][jnp.arange(L)]                    # (L, H)
    te = params["type_emb"][0]                               # (H,)  token_type_ids == 0
    x = (we + pe[None, :, :] + te[None, None, :]).astype(jnp.float32).reshape(NL, H)

    # Block-diagonal additive attention mask over (head, sequence) blocks, with the padding
    # mask (0 / -10000) folded into the key columns; built once, added once per layer.
    ext = (1.0 - attention_mask.astype(jnp.float32)) * -10000.0     # (N, L)
    idx = jnp.arange(R)
    hh = idx // NL                                                  # head index of a row/col
    bb = (idx // L) % N                                             # sequence index
    jj = idx % L                                                    # position within sequence
    allowed = (hh[:, None] == hh[None, :]) & (bb[:, None] == bb[None, :])
    mask_bd = jnp.where(allowed, ext[bb, jj][None, :], NEG_INF)     # (R, R) f32

    s = params["stacked"]

    # Single kernel invocation (no grid): whole batch, all layers, pooler + classifier fused.
    out = pl.pallas_call(
        _bert_kernel,
        out_shape=jax.ShapeDtypeStruct((N, CLASSES), jnp.float32),
        scratch_shapes=[pltpu.VMEM((R, HEADS * H), jnp.float32),    # block-diagonal QKV operand
                        pltpu.VMEM((NL, H), jnp.float32)],          # head->token ctx repack
    )(x, mask_bd,
      s["emb_ln_g"], s["emb_ln_b"],
      s["wqkv"], s["bqkv"], s["wo"], s["bo"], s["ln1_g"], s["ln1_b"],
      s["w1"], s["b1"], s["w2"], s["b2"], s["ln2_g"], s["ln2_b"],
      s["pool_w"], s["pool_b"], s["cls_w"], s["cls_b"])

    return out


if __name__ == "__main__":
    key = jax.random.PRNGKey(0)
    pkey, ikey = jax.random.split(key)
    params = init_params(pkey)

    input_ids = jax.random.randint(ikey, (N, L), 0, VOCAB, dtype=jnp.int32)
    attention_mask = jnp.array([[1, 1, 1, 1, 1, 1, 1, 1],
                                [1, 1, 1, 1, 1, 1, 0, 0]], dtype=jnp.int32)

    logits = bert_sequence_classifier(params, input_ids, attention_mask)
    logits = jax.block_until_ready(logits)
    assert logits.shape == (N, CLASSES) and logits.dtype == jnp.float32
    assert bool(jnp.all(jnp.isfinite(logits)))
    print("KERNEL_OK")
</pallas_src>

<mosaic_0001>
module attributes {stable_mosaic.version = 11 : i64} {
  func.func @_bert_kernel(%arg0: memref<16x32xf32, #tpu.memory_space<vmem>>, %arg1: memref<64x64xf32, #tpu.memory_space<vmem>>, %arg2: memref<1x32xf32, #tpu.memory_space<vmem>>, %arg3: memref<1x32xf32, #tpu.memory_space<vmem>>, %arg4: memref<2x128x24xbf16, #tpu.memory_space<vmem>>, %arg5: memref<2x64x24xf32, #tpu.memory_space<vmem>>, %arg6: memref<2x32x32xbf16, #tpu.memory_space<vmem>>, %arg7: memref<2x1x32xf32, #tpu.memory_space<vmem>>, %arg8: memref<2x1x32xf32, #tpu.memory_space<vmem>>, %arg9: memref<2x1x32xf32, #tpu.memory_space<vmem>>, %arg10: memref<2x32x128xbf16, #tpu.memory_space<vmem>>, %arg11: memref<2x1x128xf32, #tpu.memory_space<vmem>>, %arg12: memref<2x128x32xbf16, #tpu.memory_space<vmem>>, %arg13: memref<2x1x32xf32, #tpu.memory_space<vmem>>, %arg14: memref<2x1x32xf32, #tpu.memory_space<vmem>>, %arg15: memref<2x1x32xf32, #tpu.memory_space<vmem>>, %arg16: memref<32x32xbf16, #tpu.memory_space<vmem>>, %arg17: memref<1x32xf32, #tpu.memory_space<vmem>>, %arg18: memref<32x2xbf16, #tpu.memory_space<vmem>>, %arg19: memref<1x2xf32, #tpu.memory_space<vmem>>, %arg20: memref<2x2xf32, #tpu.memory_space<vmem>>, %arg21: memref<64x128xf32, #tpu.memory_space<vmem>>, %arg22: memref<16x32xf32, #tpu.memory_space<vmem>>) attributes {dimension_semantics = [], scalar_prefetch = 0 : i64, scratch_operands = 2 : i64, tpu.core_type = #tpu.core_type<tc>} {
    %c0 = arith.constant 0 : index
    %c0_0 = arith.constant 0 : index
    %0 = vector.load %arg0[%c0, %c0_0] : memref<16x32xf32, #tpu.memory_space<vmem>>, vector<16x32xf32>
    %c0_1 = arith.constant 0 : index
    %c0_2 = arith.constant 0 : index
    %1 = vector.load %arg2[%c0_1, %c0_2] : memref<1x32xf32, #tpu.memory_space<vmem>>, vector<1x32xf32>
    %c0_3 = arith.constant 0 : index
    %c0_4 = arith.constant 0 : index
    %2 = vector.load %arg3[%c0_3, %c0_4] : memref<1x32xf32, #tpu.memory_space<vmem>>, vector<1x32xf32>
    %cst = arith.constant dense<0.000000e+00> : vector<16xf32>
    %3 = vector.multi_reduction <add>, %0, %cst [1] : vector<16x32xf32> to vector<16xf32>
    %4 = vector.shape_cast %3 : vector<16xf32> to vector<16x1xf32>
    %cst_5 = arith.constant 3.200000e+01 : f32
    %5 = vector.broadcast %cst_5 : f32 to vector<16x1xf32>
    %6 = arith.divf %4, %5 : vector<16x1xf32>
    %7 = arith.mulf %0, %0 : vector<16x32xf32>
    %cst_6 = arith.constant dense<0.000000e+00> : vector<16xf32>
    %8 = vector.multi_reduction <add>, %7, %cst_6 [1] : vector<16x32xf32> to vector<16xf32>
    %9 = vector.shape_cast %8 : vector<16xf32> to vector<16x1xf32>
    %cst_7 = arith.constant 3.200000e+01 : f32
    %10 = vector.broadcast %cst_7 : f32 to vector<16x1xf32>
    %11 = arith.divf %9, %10 : vector<16x1xf32>
    %12 = arith.mulf %6, %6 : vector<16x1xf32>
    %13 = arith.subf %11, %12 : vector<16x1xf32>
    %cst_8 = arith.constant 0.000000e+00 : f32
    %14 = vector.broadcast %cst_8 : f32 to vector<16x1xf32>
    %15 = arith.maximumf %13, %14 : vector<16x1xf32>
    %16 = vector.broadcast %6 : vector<16x1xf32> to vector<16x32xf32>
    %17 = arith.subf %0, %16 : vector<16x32xf32>
    %cst_9 = arith.constant 9.99999996E-13 : f32
    %18 = vector.broadcast %cst_9 : f32 to vector<16x1xf32>
    %19 = arith.addf %15, %18 : vector<16x1xf32>
    %20 = math.rsqrt %19 : vector<16x1xf32>
    %21 = vector.broadcast %20 : vector<16x1xf32> to vector<16x32xf32>
    %22 = arith.mulf %17, %21 : vector<16x32xf32>
    %23 = vector.broadcast %1 : vector<1x32xf32> to vector<16x32xf32>
    %24 = arith.mulf %22, %23 : vector<16x32xf32>
    %25 = vector.broadcast %2 : vector<1x32xf32> to vector<16x32xf32>
    %26 = arith.addf %24, %25 : vector<16x32xf32>
    %c0_10 = arith.constant 0 : index
    %c0_11 = arith.constant 0 : index
    %27 = vector.load %arg1[%c0_10, %c0_11] : memref<64x64xf32, #tpu.memory_space<vmem>>, vector<64x64xf32>
    %cst_12 = arith.constant 0.000000e+00 : f32
    %28 = vector.broadcast %cst_12 : f32 to vector<64x128xf32>
    %c0_13 = arith.constant 0 : index
    %c0_14 = arith.constant 0 : index
    %29 = vector.load %arg21[%c0_13, %c0_14] : memref<64x128xf32, #tpu.memory_space<vmem>>, vector<64x128xf32>
    tpu.vector_store %arg21[%c0_13, %c0_14], %28 {strides = array<i32>} : memref<64x128xf32, #tpu.memory_space<vmem>>, vector<64x128xf32>,
    %c0_15 = arith.constant 0 : index
    %c0_16 = arith.constant 0 : index
    %30 = vector.load %arg21[%c0_15, %c0_16] : memref<64x128xf32, #tpu.memory_space<vmem>>, vector<16x32xf32>
    tpu.vector_store %arg21[%c0_15, %c0_16], %26 {strides = array<i32>} : memref<64x128xf32, #tpu.memory_space<vmem>>, vector<16x32xf32>,
    %c16 = arith.constant 16 : index
    %c32 = arith.constant 32 : index
    %31 = vector.load %arg21[%c16, %c32] : memref<64x128xf32, #tpu.memory_space<vmem>>, vector<16x32xf32>
    tpu.vector_store %arg21[%c16, %c32], %26 {strides = array<i32>} : memref<64x128xf32, #tpu.memory_space<vmem>>, vector<16x32xf32>,
    %c32_17 = arith.constant 32 : index
    %c64 = arith.constant 64 : index
    %32 = vector.load %arg21[%c32_17, %c64] : memref<64x128xf32, #tpu.memory_space<vmem>>, vector<16x32xf32>
    tpu.vector_store %arg21[%c32_17, %c64], %26 {strides = array<i32>} : memref<64x128xf32, #tpu.memory_space<vmem>>, vector<16x32xf32>,
    %c48 = arith.constant 48 : index
    %c96 = arith.constant 96 : index
    %33 = vector.load %arg21[%c48, %c96] : memref<64x128xf32, #tpu.memory_space<vmem>>, vector<16x32xf32>
    tpu.vector_store %arg21[%c48, %c96], %26 {strides = array<i32>} : memref<64x128xf32, #tpu.memory_space<vmem>>, vector<16x32xf32>,
    %c0_18 = arith.constant 0 : index
    %c0_19 = arith.constant 0 : index
    %34 = vector.load %arg21[%c0_18, %c0_19] : memref<64x128xf32, #tpu.memory_space<vmem>>, vector<64x128xf32>
    %35 = arith.truncf %34 : vector<64x128xf32> to vector<64x128xbf16>
    %c0_20 = arith.constant 0 : index
    %c0_21 = arith.constant 0 : index
    %c0_22 = arith.constant 0 : index
    %36 = vector.load %arg4[%c0_20, %c0_21, %c0_22] : memref<2x128x24xbf16, #tpu.memory_space<vmem>>, vector<1x128x24xbf16>
    %37 = vector.shape_cast %36 : vector<1x128x24xbf16> to vector<128x24xbf16>
    %cst_23 = arith.constant dense<0.000000e+00> : vector<64x24xf32>
    %38 = tpu.matmul %35, %37, %cst_23 {dimension_numbers = #tpu.dot_dimension_numbers<[1], [0], [0], [1], [0, 0, 1, 1], [], []>} : vector<64x128xbf16>, vector<128x24xbf16>, vector<64x24xf32> -> vector<64x24xf32>
    %c0_24 = arith.constant 0 : index
    %c0_25 = arith.constant 0 : index
    %c0_26 = arith.constant 0 : index
    %39 = vector.load %arg5[%c0_24, %c0_25, %c0_26] : memref<2x64x24xf32, #tpu.memory_space<vmem>>, vector<1x64x24xf32>
    %40 = vector.shape_cast %39 : vector<1x64x24xf32> to vector<64x24xf32>
    %41 = arith.addf %38, %40 : vector<64x24xf32>
    %42 = vector.extract_strided_slice %41 {offsets = [0, 0], sizes = [64, 8], strides = [1, 1]} : vector<64x24xf32> to vector<64x8xf32>
    %43 = arith.truncf %42 : vector<64x8xf32> to vector<64x8xbf16>
    %44 = vector.extract_strided_slice %41 {offsets = [0, 8], sizes = [64, 8], strides = [1, 1]} : vector<64x24xf32> to vector<64x8xf32>
    %45 = arith.truncf %44 : vector<64x8xf32> to vector<64x8xbf16>
    %46 = vector.extract_strided_slice %41 {offsets = [0, 16], sizes = [64, 8], strides = [1, 1]} : vector<64x24xf32> to vector<64x8xf32>
    %47 = arith.truncf %46 : vector<64x8xf32> to vector<64x8xbf16>
    %cst_27 = arith.constant dense<0.000000e+00> : vector<64x64xf32>
    %48 = tpu.matmul %43, %45, %cst_27 {dimension_numbers = #tpu.dot_dimension_numbers<[1], [1], [0], [0], [0, 0, 1, 0], [], []>} : vector<64x8xbf16>, vector<64x8xbf16>, vector<64x64xf32> -> vector<64x64xf32>
    %49 = arith.addf %48, %27 : vector<64x64xf32>
    %cst_28 = arith.constant dense<0xFF800000> : vector<64xf32>
    %50 = vector.multi_reduction <maximumf>, %49, %cst_28 [1] : vector<64x64xf32> to vector<64xf32>
    %51 = vector.shape_cast %50 : vector<64xf32> to vector<64x1xf32>
    %52 = vector.broadcast %51 : vector<64x1xf32> to vector<64x64xf32>
    %53 = arith.subf %49, %52 : vector<64x64xf32>
    %54 = math.exp %53 : vector<64x64xf32>
    %cst_29 = arith.constant dense<0.000000e+00> : vector<64xf32>
    %55 = vector.multi_reduction <add>, %54, %cst_29 [1] : vector<64x64xf32> to vector<64xf32>
    %56 = vector.shape_cast %55 : vector<64xf32> to vector<64x1xf32>
    %57 = tpu.reciprocal %56 {approx = true} : vector<64x1xf32> -> vector<64x1xf32>
    %58 = vector.broadcast %57 : vector<64x1xf32> to vector<64x64xf32>
    %59 = arith.mulf %54, %58 : vector<64x64xf32>
    %60 = arith.truncf %59 : vector<64x64xf32> to vector<64x64xbf16>
    %cst_30 = arith.constant dense<0.000000e+00> : vector<64x8xf32>
    %61 = tpu.matmul %60, %47, %cst_30 {dimension_numbers = #tpu.dot_dimension_numbers<[1], [0], [0], [1], [0, 0, 1, 1], [], []>} : vector<64x64xbf16>, vector<64x8xbf16>, vector<64x8xf32> -> vector<64x8xf32>
    %62 = vector.extract_strided_slice %61 {offsets = [0, 0], sizes = [16, 8], strides = [1, 1]} : vector<64x8xf32> to vector<16x8xf32>
    %c0_31 = arith.constant 0 : index
    %c0_32 = arith.constant 0 : index
    %63 = vector.load %arg22[%c0_31, %c0_32] : memref<16x32xf32, #tpu.memory_space<vmem>>, vector<16x8xf32>
    tpu.vector_store %arg22[%c0_31, %c0_32], %62 {strides = array<i32>} : memref<16x32xf32, #tpu.memory_space<vmem>>, vector<16x8xf32>,
    %64 = vector.extract_strided_slice %61 {offsets = [16, 0], sizes = [16, 8], strides = [1, 1]} : vector<64x8xf32> to vector<16x8xf32>
    %c0_33 = arith.constant 0 : index
    %c8 = arith.constant 8 : index
    %65 = vector.load %arg22[%c0_33, %c8] : memref<16x32xf32, #tpu.memory_space<vmem>>, vector<16x8xf32>
    tpu.vector_store %arg22[%c0_33, %c8], %64 {strides = array<i32>} : memref<16x32xf32, #tpu.memory_space<vmem>>, vector<16x8xf32>,
    %66 = vector.extract_strided_slice %61 {offsets = [32, 0], sizes = [16, 8], strides = [1, 1]} : vector<64x8xf32> to vector<16x8xf32>
    %c0_34 = arith.constant 0 : index
    %c16_35 = arith.constant 16 : index
    %67 = vector.load %arg22[%c0_34, %c16_35] : memref<16x32xf32, #tpu.memory_space<vmem>>, vector<16x8xf32>
    tpu.vector_store %arg22[%c0_34, %c16_35], %66 {strides = array<i32>} : memref<16x32xf32, #tpu.memory_space<vmem>>, vector<16x8xf32>,
    %68 = vector.extract_strided_slice %61 {offsets = [48, 0], sizes = [16, 8], strides = [1, 1]} : vector<64x8xf32> to vector<16x8xf32>
    %c0_36 = arith.constant 0 : index
    %c24 = arith.constant 24 : index
    %69 = vector.load %arg22[%c0_36, %c24] : memref<16x32xf32, #tpu.memory_space<vmem>>, vector<16x8xf32>
    tpu.vector_store %arg22[%c0_36, %c24], %68 {strides = array<i32>} : memref<16x32xf32, #tpu.memory_space<vmem>>, vector<16x8xf32>,
    %c0_37 = arith.constant 0 : index
    %c0_38 = arith.constant 0 : index
    %70 = vector.load %arg22[%c0_37, %c0_38] : memref<16x32xf32, #tpu.memory_space<vmem>>, vector<16x32xf32>
    %71 = arith.truncf %70 : vector<16x32xf32> to vector<16x32xbf16>
    %c0_39 = arith.constant 0 : index
    %c0_40 = arith.constant 0 : index
    %c0_41 = arith.constant 0 : index
    %72 = vector.load %arg6[%c0_39, %c0_40, %c0_41] : memref<2x32x32xbf16, #tpu.memory_space<vmem>>, vector<1x32x32xbf16>
    %73 = vector.shape_cast %72 : vector<1x32x32xbf16> to vector<32x32xbf16>
    %cst_42 = arith.constant dense<0.000000e+00> : vector<16x32xf32>
    %74 = tpu.matmul %71, %73, %cst_42 {dimension_numbers = #tpu.dot_dimension_numbers<[1], [0], [0], [1], [0, 0, 1, 1], [], []>} : vector<16x32xbf16>, vector<32x32xbf16>, vector<16x32xf32> -> vector<16x32xf32>
    %c0_43 = arith.constant 0 : index
    %c0_44 = arith.constant 0 : index
    %c0_45 = arith.constant 0 : index
    %75 = vector.load %arg7[%c0_43, %c0_44, %c0_45] : memref<2x1x32xf32, #tpu.memory_space<vmem>>, vector<1x1x32xf32>
    %76 = vector.shape_cast %75 : vector<1x1x32xf32> to vector<1x32xf32>
    %77 = vector.broadcast %76 : vector<1x32xf32> to vector<16x32xf32>
    %78 = arith.addf %74, %77 : vector<16x32xf32>
    %79 = arith.addf %78, %26 : vector<16x32xf32>
    %c0_46 = arith.constant 0 : index
    %c0_47 = arith.constant 0 : index
    %c0_48 = arith.constant 0 : index
    %80 = vector.load %arg8[%c0_46, %c0_47, %c0_48] : memref<2x1x32xf32, #tpu.memory_space<vmem>>, vector<1x1x32xf32>
    %81 = vector.shape_cast %80 : vector<1x1x32xf32> to vector<1x32xf32>
    %c0_49 = arith.constant 0 : index
    %c0_50 = arith.constant 0 : index
    %c0_51 = arith.constant 0 : index
    %82 = vector.load %arg9[%c0_49, %c0_50, %c0_51] : memref<2x1x32xf32, #tpu.memory_space<vmem>>, vector<1x1x32xf32>
    %83 = vector.shape_cast %82 : vector<1x1x32xf32> to vector<1x32xf32>
    %cst_52 = arith.constant dense<0.000000e+00> : vector<16xf32>
    %84 = vector.multi_reduction <add>, %79, %cst_52 [1] : vector<16x32xf32> to vector<16xf32>
    %85 = vector.shape_cast %84 : vector<16xf32> to vector<16x1xf32>
    %cst_53 = arith.constant 3.200000e+01 : f32
    %86 = vector.broadcast %cst_53 : f32 to vector<16x1xf32>
    %87 = arith.divf %85, %86 : vector<16x1xf32>
    %88 = arith.mulf %79, %79 : vector<16x32xf32>
    %cst_54 = arith.constant dense<0.000000e+00> : vector<16xf32>
    %89 = vector.multi_reduction <add>, %88, %cst_54 [1] : vector<16x32xf32> to vector<16xf32>
    %90 = vector.shape_cast %89 : vector<16xf32> to vector<16x1xf32>
    %cst_55 = arith.constant 3.200000e+01 : f32
    %91 = vector.broadcast %cst_55 : f32 to vector<16x1xf32>
    %92 = arith.divf %90, %91 : vector<16x1xf32>
    %93 = arith.mulf %87, %87 : vector<16x1xf32>
    %94 = arith.subf %92, %93 : vector<16x1xf32>
    %cst_56 = arith.constant 0.000000e+00 : f32
    %95 = vector.broadcast %cst_56 : f32 to vector<16x1xf32>
    %96 = arith.maximumf %94, %95 : vector<16x1xf32>
    %97 = vector.broadcast %87 : vector<16x1xf32> to vector<16x32xf32>
    %98 = arith.subf %79, %97 : vector<16x32xf32>
    %cst_57 = arith.constant 9.99999996E-13 : f32
    %99 = vector.broadcast %cst_57 : f32 to vector<16x1xf32>
    %100 = arith.addf %96, %99 : vector<16x1xf32>
    %101 = math.rsqrt %100 : vector<16x1xf32>
    %102 = vector.broadcast %101 : vector<16x1xf32> to vector<16x32xf32>
    %103 = arith.mulf %98, %102 : vector<16x32xf32>
    %104 = vector.broadcast %81 : vector<1x32xf32> to vector<16x32xf32>
    %105 = arith.mulf %103, %104 : vector<16x32xf32>
    %106 = vector.broadcast %83 : vector<1x32xf32> to vector<16x32xf32>
    %107 = arith.addf %105, %106 : vector<16x32xf32>
    %108 = arith.truncf %107 : vector<16x32xf32> to vector<16x32xbf16>
    %c0_58 = arith.constant 0 : index
    %c0_59 = arith.constant 0 : index
    %c0_60 = arith.constant 0 : index
    %109 = vector.load %arg10[%c0_58, %c0_59, %c0_60] : memref<2x32x128xbf16, #tpu.memory_space<vmem>>, vector<1x32x128xbf16>
    %110 = vector.shape_cast %109 : vector<1x32x128xbf16> to vector<32x128xbf16>
    %cst_61 = arith.constant dense<0.000000e+00> : vector<16x128xf32>
    %111 = tpu.matmul %108, %110, %cst_61 {dimension_numbers = #tpu.dot_dimension_numbers<[1], [0], [0], [1], [0, 0, 1, 1], [], []>} : vector<16x32xbf16>, vector<32x128xbf16>, vector<16x128xf32> -> vector<16x128xf32>
    %c0_62 = arith.constant 0 : index
    %c0_63 = arith.constant 0 : index
    %c0_64 = arith.constant 0 : index
    %112 = vector.load %arg11[%c0_62, %c0_63, %c0_64] : memref<2x1x128xf32, #tpu.memory_space<vmem>>, vector<1x1x128xf32>
    %113 = vector.shape_cast %112 : vector<1x1x128xf32> to vector<1x128xf32>
    %114 = vector.broadcast %113 : vector<1x128xf32> to vector<16x128xf32>
    %115 = arith.addf %111, %114 : vector<16x128xf32>
    %cst_65 = arith.constant 5.000000e-01 : f32
    %116 = vector.broadcast %cst_65 : f32 to vector<16x128xf32>
    %117 = arith.mulf %116, %115 : vector<16x128xf32>
    %cst_66 = arith.constant 0.636619746 : f32
    %118 = math.sqrt %cst_66 : f32
    %cst_67 = arith.constant 4.471500e-02 : f32
    %119 = vector.broadcast %cst_67 : f32 to vector<16x128xf32>
    %120 = arith.mulf %119, %115 : vector<16x128xf32>
    %121 = arith.mulf %120, %115 : vector<16x128xf32>
    %122 = arith.mulf %121, %115 : vector<16x128xf32>
    %123 = arith.addf %115, %122 : vector<16x128xf32>
    %124 = vector.broadcast %118 : f32 to vector<16x128xf32>
    %125 = arith.mulf %124, %123 : vector<16x128xf32>
    %126 = math.tanh %125 : vector<16x128xf32>
    %cst_68 = arith.constant 1.000000e+00 : f32
    %127 = vector.broadcast %cst_68 : f32 to vector<16x128xf32>
    %128 = arith.addf %127, %126 : vector<16x128xf32>
    %129 = arith.mulf %117, %128 : vector<16x128xf32>
    %130 = arith.truncf %129 : vector<16x128xf32> to vector<16x128xbf16>
    %c0_69 = arith.constant 0 : index
    %c0_70 = arith.constant 0 : index
    %c0_71 = arith.constant 0 : index
    %131 = vector.load %arg12[%c0_69, %c0_70, %c0_71] : memref<2x128x32xbf16, #tpu.memory_space<vmem>>, vector<1x128x32xbf16>
    %132 = vector.shape_cast %131 : vector<1x128x32xbf16> to vector<128x32xbf16>
    %cst_72 = arith.constant dense<0.000000e+00> : vector<16x32xf32>
    %133 = tpu.matmul %130, %132, %cst_72 {dimension_numbers = #tpu.dot_dimension_numbers<[1], [0], [0], [1], [0, 0, 1, 1], [], []>} : vector<16x128xbf16>, vector<128x32xbf16>, vector<16x32xf32> -> vector<16x32xf32>
    %c0_73 = arith.constant 0 : index
    %c0_74 = arith.constant 0 : index
    %c0_75 = arith.constant 0 : index
    %134 = vector.load %arg13[%c0_73, %c0_74, %c0_75] : memref<2x1x32xf32, #tpu.memory_space<vmem>>, vector<1x1x32xf32>
    %135 = vector.shape_cast %134 : vector<1x1x32xf32> to vector<1x32xf32>
    %136 = vector.broadcast %135 : vector<1x32xf32> to vector<16x32xf32>
    %137 = arith.addf %133, %136 : vector<16x32xf32>
    %138 = arith.addf %137, %107 : vector<16x32xf32>
    %c0_76 = arith.constant 0 : index
    %c0_77 = arith.constant 0 : index
    %c0_78 = arith.constant 0 : index
    %139 = vector.load %arg14[%c0_76, %c0_77, %c0_78] : memref<2x1x32xf32, #tpu.memory_space<vmem>>, vector<1x1x32xf32>
    %140 = vector.shape_cast %139 : vector<1x1x32xf32> to vector<1x32xf32>
    %c0_79 = arith.constant 0 : index
    %c0_80 = arith.constant 0 : index
    %c0_81 = arith.constant 0 : index
    %141 = vector.load %arg15[%c0_79, %c0_80, %c0_81] : memref<2x1x32xf32, #tpu.memory_space<vmem>>, vector<1x1x32xf32>
    %142 = vector.shape_cast %141 : vector<1x1x32xf32> to vector<1x32xf32>
    %cst_82 = arith.constant dense<0.000000e+00> : vector<16xf32>
    %143 = vector.multi_reduction <add>, %138, %cst_82 [1] : vector<16x32xf32> to vector<16xf32>
    %144 = vector.shape_cast %143 : vector<16xf32> to vector<16x1xf32>
    %cst_83 = arith.constant 3.200000e+01 : f32
    %145 = vector.broadcast %cst_83 : f32 to vector<16x1xf32>
    %146 = arith.divf %144, %145 : vector<16x1xf32>
    %147 = arith.mulf %138, %138 : vector<16x32xf32>
    %cst_84 = arith.constant dense<0.000000e+00> : vector<16xf32>
    %148 = vector.multi_reduction <add>, %147, %cst_84 [1] : vector<16x32xf32> to vector<16xf32>
    %149 = vector.shape_cast %148 : vector<16xf32> to vector<16x1xf32>
    %cst_85 = arith.constant 3.200000e+01 : f32
    %150 = vector.broadcast %cst_85 : f32 to vector<16x1xf32>
    %151 = arith.divf %149, %150 : vector<16x1xf32>
    %152 = arith.mulf %146, %146 : vector<16x1xf32>
    %153 = arith.subf %151, %152 : vector<16x1xf32>
    %cst_86 = arith.constant 0.000000e+00 : f32
    %154 = vector.broadcast %cst_86 : f32 to vector<16x1xf32>
    %155 = arith.maximumf %153, %154 : vector<16x1xf32>
    %156 = vector.broadcast %146 : vector<16x1xf32> to vector<16x32xf32>
    %157 = arith.subf %138, %156 : vector<16x32xf32>
    %cst_87 = arith.constant 9.99999996E-13 : f32
    %158 = vector.broadcast %cst_87 : f32 to vector<16x1xf32>
    %159 = arith.addf %155, %158 : vector<16x1xf32>
    %160 = math.rsqrt %159 : vector<16x1xf32>
    %161 = vector.broadcast %160 : vector<16x1xf32> to vector<16x32xf32>
    %162 = arith.mulf %157, %161 : vector<16x32xf32>
    %163 = vector.broadcast %140 : vector<1x32xf32> to vector<16x32xf32>
    %164 = arith.mulf %162, %163 : vector<16x32xf32>
    %165 = vector.broadcast %142 : vector<1x32xf32> to vector<16x32xf32>
    %166 = arith.addf %164, %165 : vector<16x32xf32>
    %c0_88 = arith.constant 0 : index
    %c0_89 = arith.constant 0 : index
    %167 = vector.load %arg21[%c0_88, %c0_89] : memref<64x128xf32, #tpu.memory_space<vmem>>, vector<16x32xf32>
    tpu.vector_store %arg21[%c0_88, %c0_89], %166 {strides = array<i32>} : memref<64x128xf32, #tpu.memory_space<vmem>>, vector<16x32xf32>,
    %c16_90 = arith.constant 16 : index
    %c32_91 = arith.constant 32 : index
    %168 = vector.load %arg21[%c16_90, %c32_91] : memref<64x128xf32, #tpu.memory_space<vmem>>, vector<16x32xf32>
    tpu.vector_store %arg21[%c16_90, %c32_91], %166 {strides = array<i32>} : memref<64x128xf32, #tpu.memory_space<vmem>>, vector<16x32xf32>,
    %c32_92 = arith.constant 32 : index
    %c64_93 = arith.constant 64 : index
    %169 = vector.load %arg21[%c32_92, %c64_93] : memref<64x128xf32, #tpu.memory_space<vmem>>, vector<16x32xf32>
    tpu.vector_store %arg21[%c32_92, %c64_93], %166 {strides = array<i32>} : memref<64x128xf32, #tpu.memory_space<vmem>>, vector<16x32xf32>,
    %c48_94 = arith.constant 48 : index
    %c96_95 = arith.constant 96 : index
    %170 = vector.load %arg21[%c48_94, %c96_95] : memref<64x128xf32, #tpu.memory_space<vmem>>, vector<16x32xf32>
    tpu.vector_store %arg21[%c48_94, %c96_95], %166 {strides = array<i32>} : memref<64x128xf32, #tpu.memory_space<vmem>>, vector<16x32xf32>,
    %c0_96 = arith.constant 0 : index
    %c0_97 = arith.constant 0 : index
    %171 = vector.load %arg21[%c0_96, %c0_97] : memref<64x128xf32, #tpu.memory_space<vmem>>, vector<64x128xf32>
    %172 = arith.truncf %171 : vector<64x128xf32> to vector<64x128xbf16>
    %c1 = arith.constant 1 : index
    %c0_98 = arith.constant 0 : index
    %c0_99 = arith.constant 0 : index
    %173 = vector.load %arg4[%c1, %c0_98, %c0_99] : memref<2x128x24xbf16, #tpu.memory_space<vmem>>, vector<1x128x24xbf16>
    %174 = vector.shape_cast %173 : vector<1x128x24xbf16> to vector<128x24xbf16>
    %cst_100 = arith.constant dense<0.000000e+00> : vector<64x24xf32>
    %175 = tpu.matmul %172, %174, %cst_100 {dimension_numbers = #tpu.dot_dimension_numbers<[1], [0], [0], [1], [0, 0, 1, 1], [], []>} : vector<64x128xbf16>, vector<128x24xbf16>, vector<64x24xf32> -> vector<64x24xf32>
    %c1_101 = arith.constant 1 : index
    %c0_102 = arith.constant 0 : index
    %c0_103 = arith.constant 0 : index
    %176 = vector.load %arg5[%c1_101, %c0_102, %c0_103] : memref<2x64x24xf32, #tpu.memory_space<vmem>>, vector<1x64x24xf32>
    %177 = vector.shape_cast %176 : vector<1x64x24xf32> to vector<64x24xf32>
    %178 = arith.addf %175, %177 : vector<64x24xf32>
    %179 = vector.extract_strided_slice %178 {offsets = [0, 0], sizes = [64, 8], strides = [1, 1]} : vector<64x24xf32> to vector<64x8xf32>
    %180 = arith.truncf %179 : vector<64x8xf32> to vector<64x8xbf16>
    %181 = vector.extract_strided_slice %178 {offsets = [0, 8], sizes = [64, 8], strides = [1, 1]} : vector<64x24xf32> to vector<64x8xf32>
    %182 = arith.truncf %181 : vector<64x8xf32> to vector<64x8xbf16>
    %183 = vector.extract_strided_slice %178 {offsets = [0, 16], sizes = [64, 8], strides = [1, 1]} : vector<64x24xf32> to vector<64x8xf32>
    %184 = arith.truncf %183 : vector<64x8xf32> to vector<64x8xbf16>
    %cst_104 = arith.constant dense<0.000000e+00> : vector<64x64xf32>
    %185 = tpu.matmul %180, %182, %cst_104 {dimension_numbers = #tpu.dot_dimension_numbers<[1], [1], [0], [0], [0, 0, 1, 0], [], []>} : vector<64x8xbf16>, vector<64x8xbf16>, vector<64x64xf32> -> vector<64x64xf32>
    %186 = arith.addf %185, %27 : vector<64x64xf32>
    %cst_105 = arith.constant dense<0xFF800000> : vector<64xf32>
    %187 = vector.multi_reduction <maximumf>, %186, %cst_105 [1] : vector<64x64xf32> to vector<64xf32>
    %188 = vector.shape_cast %187 : vector<64xf32> to vector<64x1xf32>
    %189 = vector.broadcast %188 : vector<64x1xf32> to vector<64x64xf32>
    %190 = arith.subf %186, %189 : vector<64x64xf32>
    %191 = math.exp %190 : vector<64x64xf32>
    %cst_106 = arith.constant dense<0.000000e+00> : vector<64xf32>
    %192 = vector.multi_reduction <add>, %191, %cst_106 [1] : vector<64x64xf32> to vector<64xf32>
    %193 = vector.shape_cast %192 : vector<64xf32> to vector<64x1xf32>
    %194 = tpu.reciprocal %193 {approx = true} : vector<64x1xf32> -> vector<64x1xf32>
    %195 = vector.broadcast %194 : vector<64x1xf32> to vector<64x64xf32>
    %196 = arith.mulf %191, %195 : vector<64x64xf32>
    %197 = arith.truncf %196 : vector<64x64xf32> to vector<64x64xbf16>
    %cst_107 = arith.constant dense<0.000000e+00> : vector<64x8xf32>
    %198 = tpu.matmul %197, %184, %cst_107 {dimension_numbers = #tpu.dot_dimension_numbers<[1], [0], [0], [1], [0, 0, 1, 1], [], []>} : vector<64x64xbf16>, vector<64x8xbf16>, vector<64x8xf32> -> vector<64x8xf32>
    %199 = vector.extract_strided_slice %198 {offsets = [0, 0], sizes = [16, 8], strides = [1, 1]} : vector<64x8xf32> to vector<16x8xf32>
    %c0_108 = arith.constant 0 : index
    %c0_109 = arith.constant 0 : index
    %200 = vector.load %arg22[%c0_108, %c0_109] : memref<16x32xf32, #tpu.memory_space<vmem>>, vector<16x8xf32>
    tpu.vector_store %arg22[%c0_108, %c0_109], %199 {strides = array<i32>} : memref<16x32xf32, #tpu.memory_space<vmem>>, vector<16x8xf32>,
    %201 = vector.extract_strided_slice %198 {offsets = [16, 0], sizes = [16, 8], strides = [1, 1]} : vector<64x8xf32> to vector<16x8xf32>
    %c0_110 = arith.constant 0 : index
    %c8_111 = arith.constant 8 : index
    %202 = vector.load %arg22[%c0_110, %c8_111] : memref<16x32xf32, #tpu.memory_space<vmem>>, vector<16x8xf32>
    tpu.vector_store %arg22[%c0_110, %c8_111], %201 {strides = array<i32>} : memref<16x32xf32, #tpu.memory_space<vmem>>, vector<16x8xf32>,
    %203 = vector.extract_strided_slice %198 {offsets = [32, 0], sizes = [16, 8], strides = [1, 1]} : vector<64x8xf32> to vector<16x8xf32>
    %c0_112 = arith.constant 0 : index
    %c16_113 = arith.constant 16 : index
    %204 = vector.load %arg22[%c0_112, %c16_113] : memref<16x32xf32, #tpu.memory_space<vmem>>, vector<16x8xf32>
    tpu.vector_store %arg22[%c0_112, %c16_113], %203 {strides = array<i32>} : memref<16x32xf32, #tpu.memory_space<vmem>>, vector<16x8xf32>,
    %205 = vector.extract_strided_slice %198 {offsets = [48, 0], sizes = [16, 8], strides = [1, 1]} : vector<64x8xf32> to vector<16x8xf32>
    %c0_114 = arith.constant 0 : index
    %c24_115 = arith.constant 24 : index
    %206 = vector.load %arg22[%c0_114, %c24_115] : memref<16x32xf32, #tpu.memory_space<vmem>>, vector<16x8xf32>
    tpu.vector_store %arg22[%c0_114, %c24_115], %205 {strides = array<i32>} : memref<16x32xf32, #tpu.memory_space<vmem>>, vector<16x8xf32>,
    %c0_116 = arith.constant 0 : index
    %c0_117 = arith.constant 0 : index
    %207 = vector.load %arg22[%c0_116, %c0_117] : memref<16x32xf32, #tpu.memory_space<vmem>>, vector<16x32xf32>
    %208 = arith.truncf %207 : vector<16x32xf32> to vector<16x32xbf16>
    %c1_118 = arith.constant 1 : index
    %c0_119 = arith.constant 0 : index
    %c0_120 = arith.constant 0 : index
    %209 = vector.load %arg6[%c1_118, %c0_119, %c0_120] : memref<2x32x32xbf16, #tpu.memory_space<vmem>>, vector<1x32x32xbf16>
    %210 = vector.shape_cast %209 : vector<1x32x32xbf16> to vector<32x32xbf16>
    %cst_121 = arith.constant dense<0.000000e+00> : vector<16x32xf32>
    %211 = tpu.matmul %208, %210, %cst_121 {dimension_numbers = #tpu.dot_dimension_numbers<[1], [0], [0], [1], [0, 0, 1, 1], [], []>} : vector<16x32xbf16>, vector<32x32xbf16>, vector<16x32xf32> -> vector<16x32xf32>
    %c1_122 = arith.constant 1 : index
    %c0_123 = arith.constant 0 : index
    %c0_124 = arith.constant 0 : index
    %212 = vector.load %arg7[%c1_122, %c0_123, %c0_124] : memref<2x1x32xf32, #tpu.memory_space<vmem>>, vector<1x1x32xf32>
    %213 = vector.shape_cast %212 : vector<1x1x32xf32> to vector<1x32xf32>
    %214 = vector.broadcast %213 : vector<1x32xf32> to vector<16x32xf32>
    %215 = arith.addf %211, %214 : vector<16x32xf32>
    %216 = arith.addf %215, %166 : vector<16x32xf32>
    %c1_125 = arith.constant 1 : index
    %c0_126 = arith.constant 0 : index
    %c0_127 = arith.constant 0 : index
    %217 = vector.load %arg8[%c1_125, %c0_126, %c0_127] : memref<2x1x32xf32, #tpu.memory_space<vmem>>, vector<1x1x32xf32>
    %218 = vector.shape_cast %217 : vector<1x1x32xf32> to vector<1x32xf32>
    %c1_128 = arith.constant 1 : index
    %c0_129 = arith.constant 0 : index
    %c0_130 = arith.constant 0 : index
    %219 = vector.load %arg9[%c1_128, %c0_129, %c0_130] : memref<2x1x32xf32, #tpu.memory_space<vmem>>, vector<1x1x32xf32>
    %220 = vector.shape_cast %219 : vector<1x1x32xf32> to vector<1x32xf32>
    %cst_131 = arith.constant dense<0.000000e+00> : vector<16xf32>
    %221 = vector.multi_reduction <add>, %216, %cst_131 [1] : vector<16x32xf32> to vector<16xf32>
    %222 = vector.shape_cast %221 : vector<16xf32> to vector<16x1xf32>
    %cst_132 = arith.constant 3.200000e+01 : f32
    %223 = vector.broadcast %cst_132 : f32 to vector<16x1xf32>
    %224 = arith.divf %222, %223 : vector<16x1xf32>
    %225 = arith.mulf %216, %216 : vector<16x32xf32>
    %cst_133 = arith.constant dense<0.000000e+00> : vector<16xf32>
    %226 = vector.multi_reduction <add>, %225, %cst_133 [1] : vector<16x32xf32> to vector<16xf32>
    %227 = vector.shape_cast %226 : vector<16xf32> to vector<16x1xf32>
    %cst_134 = arith.constant 3.200000e+01 : f32
    %228 = vector.broadcast %cst_134 : f32 to vector<16x1xf32>
    %229 = arith.divf %227, %228 : vector<16x1xf32>
    %230 = arith.mulf %224, %224 : vector<16x1xf32>
    %231 = arith.subf %229, %230 : vector<16x1xf32>
    %cst_135 = arith.constant 0.000000e+00 : f32
    %232 = vector.broadcast %cst_135 : f32 to vector<16x1xf32>
    %233 = arith.maximumf %231, %232 : vector<16x1xf32>
    %234 = vector.broadcast %224 : vector<16x1xf32> to vector<16x32xf32>
    %235 = arith.subf %216, %234 : vector<16x32xf32>
    %cst_136 = arith.constant 9.99999996E-13 : f32
    %236 = vector.broadcast %cst_136 : f32 to vector<16x1xf32>
    %237 = arith.addf %233, %236 : vector<16x1xf32>
    %238 = math.rsqrt %237 : vector<16x1xf32>
    %239 = vector.broadcast %238 : vector<16x1xf32> to vector<16x32xf32>
    %240 = arith.mulf %235, %239 : vector<16x32xf32>
    %241 = vector.broadcast %218 : vector<1x32xf32> to vector<16x32xf32>
    %242 = arith.mulf %240, %241 : vector<16x32xf32>
    %243 = vector.broadcast %220 : vector<1x32xf32> to vector<16x32xf32>
    %244 = arith.addf %242, %243 : vector<16x32xf32>
    %245 = arith.truncf %244 : vector<16x32xf32> to vector<16x32xbf16>
    %c1_137 = arith.constant 1 : index
    %c0_138 = arith.constant 0 : index
    %c0_139 = arith.constant 0 : index
    %246 = vector.load %arg10[%c1_137, %c0_138, %c0_139] : memref<2x32x128xbf16, #tpu.memory_space<vmem>>, vector<1x32x128xbf16>
    %247 = vector.shape_cast %246 : vector<1x32x128xbf16> to vector<32x128xbf16>
    %cst_140 = arith.constant dense<0.000000e+00> : vector<16x128xf32>
    %248 = tpu.matmul %245, %247, %cst_140 {dimension_numbers = #tpu.dot_dimension_numbers<[1], [0], [0], [1], [0, 0, 1, 1], [], []>} : vector<16x32xbf16>, vector<32x128xbf16>, vector<16x128xf32> -> vector<16x128xf32>
    %c1_141 = arith.constant 1 : index
    %c0_142 = arith.constant 0 : index
    %c0_143 = arith.constant 0 : index
    %249 = vector.load %arg11[%c1_141, %c0_142, %c0_143] : memref<2x1x128xf32, #tpu.memory_space<vmem>>, vector<1x1x128xf32>
    %250 = vector.shape_cast %249 : vector<1x1x128xf32> to vector<1x128xf32>
    %251 = vector.broadcast %250 : vector<1x128xf32> to vector<16x128xf32>
    %252 = arith.addf %248, %251 : vector<16x128xf32>
    %cst_144 = arith.constant 5.000000e-01 : f32
    %253 = vector.broadcast %cst_144 : f32 to vector<16x128xf32>
    %254 = arith.mulf %253, %252 : vector<16x128xf32>
    %cst_145 = arith.constant 0.636619746 : f32
    %255 = math.sqrt %cst_145 : f32
    %cst_146 = arith.constant 4.471500e-02 : f32
    %256 = vector.broadcast %cst_146 : f32 to vector<16x128xf32>
    %257 = arith.mulf %256, %252 : vector<16x128xf32>
    %258 = arith.mulf %257, %252 : vector<16x128xf32>
    %259 = arith.mulf %258, %252 : vector<16x128xf32>
    %260 = arith.addf %252, %259 : vector<16x128xf32>
    %261 = vector.broadcast %255 : f32 to vector<16x128xf32>
    %262 = arith.mulf %261, %260 : vector<16x128xf32>
    %263 = math.tanh %262 : vector<16x128xf32>
    %cst_147 = arith.constant 1.000000e+00 : f32
    %264 = vector.broadcast %cst_147 : f32 to vector<16x128xf32>
    %265 = arith.addf %264, %263 : vector<16x128xf32>
    %266 = arith.mulf %254, %265 : vector<16x128xf32>
    %267 = arith.truncf %266 : vector<16x128xf32> to vector<16x128xbf16>
    %c1_148 = arith.constant 1 : index
    %c0_149 = arith.constant 0 : index
    %c0_150 = arith.constant 0 : index
    %268 = vector.load %arg12[%c1_148, %c0_149, %c0_150] : memref<2x128x32xbf16, #tpu.memory_space<vmem>>, vector<1x128x32xbf16>
    %269 = vector.shape_cast %268 : vector<1x128x32xbf16> to vector<128x32xbf16>
    %cst_151 = arith.constant dense<0.000000e+00> : vector<16x32xf32>
    %270 = tpu.matmul %267, %269, %cst_151 {dimension_numbers = #tpu.dot_dimension_numbers<[1], [0], [0], [1], [0, 0, 1, 1], [], []>} : vector<16x128xbf16>, vector<128x32xbf16>, vector<16x32xf32> -> vector<16x32xf32>
    %c1_152 = arith.constant 1 : index
    %c0_153 = arith.constant 0 : index
    %c0_154 = arith.constant 0 : index
    %271 = vector.load %arg13[%c1_152, %c0_153, %c0_154] : memref<2x1x32xf32, #tpu.memory_space<vmem>>, vector<1x1x32xf32>
    %272 = vector.shape_cast %271 : vector<1x1x32xf32> to vector<1x32xf32>
    %273 = vector.broadcast %272 : vector<1x32xf32> to vector<16x32xf32>
    %274 = arith.addf %270, %273 : vector<16x32xf32>
    %275 = arith.addf %274, %244 : vector<16x32xf32>
    %c1_155 = arith.constant 1 : index
    %c0_156 = arith.constant 0 : index
    %c0_157 = arith.constant 0 : index
    %276 = vector.load %arg14[%c1_155, %c0_156, %c0_157] : memref<2x1x32xf32, #tpu.memory_space<vmem>>, vector<1x1x32xf32>
    %277 = vector.shape_cast %276 : vector<1x1x32xf32> to vector<1x32xf32>
    %c1_158 = arith.constant 1 : index
    %c0_159 = arith.constant 0 : index
    %c0_160 = arith.constant 0 : index
    %278 = vector.load %arg15[%c1_158, %c0_159, %c0_160] : memref<2x1x32xf32, #tpu.memory_space<vmem>>, vector<1x1x32xf32>
    %279 = vector.shape_cast %278 : vector<1x1x32xf32> to vector<1x32xf32>
    %cst_161 = arith.constant dense<0.000000e+00> : vector<16xf32>
    %280 = vector.multi_reduction <add>, %275, %cst_161 [1] : vector<16x32xf32> to vector<16xf32>
    %281 = vector.shape_cast %280 : vector<16xf32> to vector<16x1xf32>
    %cst_162 = arith.constant 3.200000e+01 : f32
    %282 = vector.broadcast %cst_162 : f32 to vector<16x1xf32>
    %283 = arith.divf %281, %282 : vector<16x1xf32>
    %284 = arith.mulf %275, %275 : vector<16x32xf32>
    %cst_163 = arith.constant dense<0.000000e+00> : vector<16xf32>
    %285 = vector.multi_reduction <add>, %284, %cst_163 [1] : vector<16x32xf32> to vector<16xf32>
    %286 = vector.shape_cast %285 : vector<16xf32> to vector<16x1xf32>
    %cst_164 = arith.constant 3.200000e+01 : f32
    %287 = vector.broadcast %cst_164 : f32 to vector<16x1xf32>
    %288 = arith.divf %286, %287 : vector<16x1xf32>
    %289 = arith.mulf %283, %283 : vector<16x1xf32>
    %290 = arith.subf %288, %289 : vector<16x1xf32>
    %cst_165 = arith.constant 0.000000e+00 : f32
    %291 = vector.broadcast %cst_165 : f32 to vector<16x1xf32>
    %292 = arith.maximumf %290, %291 : vector<16x1xf32>
    %293 = vector.broadcast %283 : vector<16x1xf32> to vector<16x32xf32>
    %294 = arith.subf %275, %293 : vector<16x32xf32>
    %cst_166 = arith.constant 9.99999996E-13 : f32
    %295 = vector.broadcast %cst_166 : f32 to vector<16x1xf32>
    %296 = arith.addf %292, %295 : vector<16x1xf32>
    %297 = math.rsqrt %296 : vector<16x1xf32>
    %298 = vector.broadcast %297 : vector<16x1xf32> to vector<16x32xf32>
    %299 = arith.mulf %294, %298 : vector<16x32xf32>
    %300 = vector.broadcast %277 : vector<1x32xf32> to vector<16x32xf32>
    %301 = arith.mulf %299, %300 : vector<16x32xf32>
    %302 = vector.broadcast %279 : vector<1x32xf32> to vector<16x32xf32>
    %303 = arith.addf %301, %302 : vector<16x32xf32>
    %304 = arith.truncf %303 : vector<16x32xf32> to vector<16x32xbf16>
    %c0_167 = arith.constant 0 : index
    %c0_168 = arith.constant 0 : index
    %305 = vector.load %arg16[%c0_167, %c0_168] : memref<32x32xbf16, #tpu.memory_space<vmem>>, vector<32x32xbf16>
    %cst_169 = arith.constant dense<0.000000e+00> : vector<16x32xf32>
    %306 = tpu.matmul %304, %305, %cst_169 {dimension_numbers = #tpu.dot_dimension_numbers<[1], [0], [0], [1], [0, 0, 1, 1], [], []>} : vector<16x32xbf16>, vector<32x32xbf16>, vector<16x32xf32> -> vector<16x32xf32>
    %c0_170 = arith.constant 0 : index
    %c0_171 = arith.constant 0 : index
    %307 = vector.load %arg17[%c0_170, %c0_171] : memref<1x32xf32, #tpu.memory_space<vmem>>, vector<1x32xf32>
    %308 = vector.broadcast %307 : vector<1x32xf32> to vector<16x32xf32>
    %309 = arith.addf %306, %308 : vector<16x32xf32>
    %310 = math.tanh %309 : vector<16x32xf32>
    %311 = arith.truncf %310 : vector<16x32xf32> to vector<16x32xbf16>
    %c0_172 = arith.constant 0 : index
    %c0_173 = arith.constant 0 : index
    %312 = vector.load %arg18[%c0_172, %c0_173] : memref<32x2xbf16, #tpu.memory_space<vmem>>, vector<32x2xbf16>
    %cst_174 = arith.constant dense<0.000000e+00> : vector<16x2xf32>
    %313 = tpu.matmul %311, %312, %cst_174 {dimension_numbers = #tpu.dot_dimension_numbers<[1], [0], [0], [1], [0, 0, 1, 1], [], []>} : vector<16x32xbf16>, vector<32x2xbf16>, vector<16x2xf32> -> vector<16x2xf32>
    %c0_175 = arith.constant 0 : index
    %c0_176 = arith.constant 0 : index
    %314 = vector.load %arg19[%c0_175, %c0_176] : memref<1x2xf32, #tpu.memory_space<vmem>>, vector<1x2xf32>
    %315 = vector.broadcast %314 : vector<1x2xf32> to vector<16x2xf32>
    %316 = arith.addf %313, %315 : vector<16x2xf32>
    %317 = vector.extract_strided_slice %316 {offsets = [0, 0], sizes = [1, 2], strides = [1, 1]} : vector<16x2xf32> to vector<1x2xf32>
    %c0_177 = arith.constant 0 : index
    %c0_178 = arith.constant 0 : index
    %318 = vector.load %arg20[%c0_177, %c0_178] : memref<2x2xf32, #tpu.memory_space<vmem>>, vector<1x2xf32>
    tpu.vector_store %arg20[%c0_177, %c0_178], %317 {strides = array<i32>} : memref<2x2xf32, #tpu.memory_space<vmem>>, vector<1x2xf32>,
    %319 = vector.extract_strided_slice %316 {offsets = [8, 0], sizes = [1, 2], strides = [1, 1]} : vector<16x2xf32> to vector<1x2xf32>
    %c1_179 = arith.constant 1 : index
    %c0_180 = arith.constant 0 : index
    %320 = vector.load %arg20[%c1_179, %c0_180] : memref<2x2xf32, #tpu.memory_space<vmem>>, vector<1x2xf32>
    tpu.vector_store %arg20[%c1_179, %c0_180], %319 {strides = array<i32>} : memref<2x2xf32, #tpu.memory_space<vmem>>, vector<1x2xf32>,
    return
  }
}

</mosaic_0001>

<bundles_post_ra>
// kernel: tpu_custom_call.1
= control target key start
LH: loop header
LB: loop body
LE: loop exit
PB: predicated region body
PF: predicated region fallthrough
CT: control target
= control target key end

     0   :  { %s3409_s0 = inlined_call_operand.vmem [shape: f32[16,32], index: 0, kind: input, shape index: {}]   ;;  %s3410_s1 = inlined_call_operand.vmem [shape: f32[64,64], index: 1, kind: input, shape index: {}]   ;;  %s3411_s2 = inlined_call_operand.vmem [shape: f32[1,32], index: 2, kind: input, shape index: {}]   ;;  %s3412_s3 = inlined_call_operand.vmem [shape: f32[1,32], index: 3, kind: input, shape index: {}]   ;;  %s3413_s4 = inlined_call_operand.vmem [shape: bf16[2,128,24], index: 4, kind: input, shape index: {}]   ;;  %s3414_s5 = inlined_call_operand.vmem [shape: f32[2,64,24], index: 5, kind: input, shape index: {}]   ;;  %s3415_s6 = inlined_call_operand.vmem [shape: bf16[2,32,32], index: 6, kind: input, shape index: {}]   ;;  %s3416_s7 = inlined_call_operand.vmem [shape: f32[2,1,32], index: 7, kind: input, shape index: {}]   ;;  %s3417_s8 = inlined_call_operand.vmem [shape: f32[2,1,32], index: 8, kind: input, shape index: {}]   ;;  %s3418_s9 = inlined_call_operand.vmem [shape: f32[2,1,32], index: 9, kind: input, shape index: {}]   ;;  %s3419_s10 = inlined_call_operand.vmem [shape: bf16[2,32,128], index: 10, kind: input, shape index: {}]   ;;  %s3420_s11 = inlined_call_operand.vmem [shape: f32[2,1,128], index: 11, kind: input, shape index: {}]   ;;  %s3421_s12 = inlined_call_operand.vmem [shape: bf16[2,128,32], index: 12, kind: input, shape index: {}]   ;;  %s3422_s13 = inlined_call_operand.vmem [shape: f32[2,1,32], index: 13, kind: input, shape index: {}]   ;;  %s3423_s14 = inlined_call_operand.vmem [shape: f32[2,1,32], index: 14, kind: input, shape index: {}]   ;;  %s3424_s15 = inlined_call_operand.vmem [shape: f32[2,1,32], index: 15, kind: input, shape index: {}]   ;;  %s3425_s16 = inlined_call_operand.vmem [shape: bf16[32,32], index: 16, kind: input, shape index: {}]   ;;  %s3426_s17 = inlined_call_operand.vmem [shape: f32[1,32], index: 17, kind: input, shape index: {}]   ;;  %s3427_s18 = inlined_call_operand.vmem [shape: bf16[32,2], index: 18, kind: input, shape index: {}]   ;;  %s3428_s19 = inlined_call_operand.vmem [shape: f32[1,2], index: 19, kind: input, shape index: {}]   ;;  %s3429_s20 = inlined_call_operand.hbm [shape: f32[2,2], index: 20, kind: output, shape index: {}]  }
   0x1   :  { %3437 = sst [smem:[#allocation7_spill]] %s3409_s0 }
   0x2   :  { %3438 = sst [smem:[#allocation8_spill]] %s3410_s1 }
   0x3   :  { %3439 = sst [smem:[#allocation9_spill]] %s3411_s2 }
   0x4   :  { %3440 = sst [smem:[#allocation10_spill]] %s3412_s3 }
   0x5   :  { %3441 = sst [smem:[#allocation11_spill]] %s3413_s4 }
   0x6   :  { %s3442_s23 = sld [smem:[#allocation7_spill]]  ;;  %vm71_vm0 = vcmask 261120  }
   0xc   :  { %v2779_v0 = vld [vmem:[%s3442_s23] sm:$0xff]  ;;  %v2784_v1 = vld [vmem:[%s3442_s23 + $0x8] sm:$0xff] }
   0xd   :  { %v72_v2 = vsel %vm71_vm0, %v2779_v0, 0.0  ;;  %v81_v3 = vmul.f32 %v2779_v0, %v2779_v0  ;;  %v75_v4 = vsel %vm71_vm0, %v2784_v1, 0.0  ;;  %v82_v5 = vmul.f32 %v2784_v1, %v2784_v1 }
   0xe   :  { %73 = vadd.xlane.f32.xlu0 %v72_v2 }
   0xf   :  { %v83_v6 = vsel %vm71_vm0, %v81_v3, 0.0  ;;  %v86_v7 = vsel %vm71_vm0, %v82_v5, 0.0 }
  0x10   :  { %84 = vadd.xlane.f32.xlu1 %v83_v6 }
  0x12   :  { %76 = vadd.xlane.f32.xlu0 %v75_v4 }
  0x14   :  { %87 = vadd.xlane.f32.xlu1 %v86_v7 }
  0x15   :  { %25 = vsyncpa [#allocation5], 0  ;;  %v2660_v8 = vmov 0.0   ;;  %s3443_s26 = sld [smem:[#allocation11_spill]]  ;;  %s2661_s21 = smov 32   ;;  %vm147_vm1 = vcmask 523520  }
  0x16   :  { %129 = vst [vmem:[#allocation2] sm:$0xff] %v2660_v8  ;;  %130 = vst [vmem:[#allocation2 + $0x8] sm:$0xff] %v2660_v8  ;;  %s3444_s27 = sld [smem:[#allocation9_spill]]  ;;  %s2662_s1 = smov 96   ;;  %vm165_vm2 = vcmask 1048320   ;;  %vm156_vm3 = vcmask 785920  }
  0x17   :  { %131 = vst [vmem:[#allocation2 + $0x10] sm:$0xff] %v2660_v8  ;;  %132 = vst [vmem:[#allocation2 + $0x18] sm:$0xff] %v2660_v8  ;;  %s3445_s29 = sld [smem:[#allocation10_spill]]  ;;  %s2663_s22 = smov 64   ;;  %v197_v3 = vld [vmem:[%s3414_s5 + $0x8] sm:$0xff]  ;;  %vm333_vm4 = vcmask 64512  }
  0x18   :  { %133 = vst [vmem:[#allocation2 + $0x20] sm:$0xff] %v2660_v8  ;;  %134 = vst [vmem:[#allocation2 + $0x28] sm:$0xff] %v2660_v8  ;;  %vm423_vm5 = vcmask 523264   ;;  %s2666_s25 = smov 8   ;;  %vm2667_vm6 = vmmov 0   ;;  %s3435_s0 = smov 16  }
  0x19   :  { %135 = vst [vmem:[#allocation2 + $0x30] sm:$0xff] %v2660_v8  ;;  %136 = vst [vmem:[#allocation2 + $0x38] sm:$0xff] %v2660_v8  ;;  %s3433_s23 = smov 24   ;;  %vm615_vm7 = vcmask 130112   ;;  %vm626_vm8 = vcmask 195712   ;;  %vm637_vm9 = vcmask 261312  }
  0x1a   :  { %s3447_s30 = smov 16   ;;  %s3448_s24 = smov 24   ;;  %vm2031_vm10 = vcmask 8192  }
  0x1b   :  { %v2498_v9 = vld [vmem:[%s3443_s26 + $0x38] sm:$0xff]   ;;  %v2499_v10 = vld [vmem:[%s3443_s26 + $0x30] sm:$0xff]   ;;  %v2500_v11 = vld [vmem:[%s3443_s26 + $0x28] sm:$0xff]  }
  0x1c   :  { %2279 = vmatprep.subr.bf16.mxu0 %v2498_v9  ;;  %v2501_v12 = vld [vmem:[%s3443_s26 + $0x20] sm:$0xff]   ;;  %v2502_v13 = vld [vmem:[%s3443_s26 + $0x18] sm:$0xff]   ;;  %v2503_v30 = vld [vmem:[%s3443_s26 + $0x10] sm:$0xff]  }
  0x1d   :  { %2280 = vmatpush3.bf16.msra.mxu0 %v2498_v9  ;;  %v2504_v31 = vld [vmem:[%s3443_s26 + $0x8] sm:$0xff]   ;;  %v2048_v34 = vld [vmem:[%s3444_s27] ss:$0 sm:$0xff]  ;;  %s2664_s27 = smov 120  }
  0x1e   :  { %2281 = vmatprep.subr.bf16.mxu0 %v2499_v10  ;;  %v2049_v36 = vld [vmem:[%s3445_s29] ss:$0 sm:$0xff]  ;;  %s3446_s29 = sld [smem:[#allocation8_spill]] }
  0x1f   :  { %v2505_v37 = vld [vmem:[%s3443_s26] sm:$0xff]  }
  0x21   :  { %2282 = vmatpush3.bf16.msra.mxu0 %v2499_v10  ;;  %v202_v10 = vld [vmem:[%s3414_s5 + $0x30] sm:$0xff] }
  0x22   :  { %2283 = vmatprep.subr.bf16.mxu0 %v2500_v11 }
  0x25   :  { %2284 = vmatpush3.bf16.msra.mxu0 %v2500_v11 }
  0x26   :  { %2285 = vmatprep.subr.bf16.mxu0 %v2501_v12 }
  0x29   :  { %2286 = vmatpush3.bf16.msra.mxu0 %v2501_v12  ;;  %v203_v12 = vld [vmem:[%s3414_s5 + $0x38] sm:$0xff] }
  0x2a   :  { %2287 = vmatprep.subr.bf16.mxu0 %v2502_v13 }
  0x2d   :  { %2288 = vmatpush3.bf16.msra.mxu0 %v2502_v13  ;;  %v199_v13 = vld [vmem:[%s3414_s5 + $0x18] sm:$0xff] }
  0x2e   :  { %2289 = vmatprep.subr.bf16.mxu0 %v2503_v30 }
  0x31   :  { %2290 = vmatpush3.bf16.msra.mxu0 %v2503_v30 }
  0x32   :  { %2291 = vmatprep.subr.bf16.mxu0 %v2504_v31 }
  0x35   :  { %2292 = vmatpush3.bf16.msra.mxu0 %v2504_v31 }
  0x36   :  { %2293 = vmatprep.subr.bf16.mxu0 %v2505_v37 }
  0x39   :  { %2294 = vmatpush3.bf16.msra.mxu0 %v2505_v37  ;;  %v2922_v37 = vld [vmem:[%s3446_s29] sm:$0xff] }
  0x97   :  { %v74_v14 = vpop.xlane.xlu0 %73 }
  0x98   :  { %v79_v15 = vmul.f32 0.03125, %v74_v14  ;;  %v200_v14 = vld [vmem:[%s3414_s5 + $0x20] sm:$0xff] }
  0x99   :  { %v85_v16 = vpop.xlane.xlu1 %84 }
  0x9a   :  { %v91_v17 = vmul.f32 %v79_v15, %v79_v15  ;;  %v89_v18 = vmul.f32 0.03125, %v85_v16  ;;  %v97_v32 = vsub.f32 %v2779_v0, %v79_v15  ;;  %v201_v16 = vld [vmem:[%s3414_s5 + $0x28] sm:$0xff] }
  0x9b   :  { %v77_v19 = vpop.xlane.xlu0 %76 }
  0x9c   :  { %v93_v20 = vsub.f32 %v89_v18, %v91_v17  ;;  %v80_v21 = vmul.f32 0.03125, %v77_v19  ;;  %v198_v19 = vld [vmem:[%s3414_s5 + $0x10] sm:$0xff] }
  0x9d   :  { %v88_v22 = vpop.xlane.xlu1 %87 }
  0x9e   :  { %v95_v23 = vmax.f32 %v93_v20, 0.0  ;;  %v92_v24 = vmul.f32 %v80_v21, %v80_v21  ;;  %v90_v25 = vmul.f32 0.03125, %v88_v22  ;;  %v98_v38 = vsub.f32 %v2784_v1, %v80_v21  ;;  %v196_v1 = vld [vmem:[%s3414_s5] sm:$0xff] }
  0xa0   :  { %v99_v26 = vadd.f32 1e-12, %v95_v23  ;;  %v94_v27 = vsub.f32 %v90_v25, %v92_v24 }
  0xa2   :  { %2542 = vrsqrt.f32 %v99_v26  ;;  %v96_v28 = vmax.f32 %v94_v27, 0.0 }
  0xa4   :  { %v100_v29 = vadd.f32 1e-12, %v96_v28 }
  0xa6   :  { %2544 = vrsqrt.f32 %v100_v29 }
  0xaf   :  { %v2543_v33 = vpop.eup %2542 }
  0xb0   :  { %v103_v35 = vmul.f32 %v2543_v33, %v97_v32 }
  0xb2   :  { %v111_v39 = vmul.f32 %v2048_v34, %v103_v35 }
  0xb3   :  { %v2545_v40 = vpop.eup %2544 }
  0xb4   :  { %v2836_v41 = vadd.f32 %v2049_v36, %v111_v39  ;;  %v104_v42 = vmul.f32 %v2545_v40, %v98_v38  ;;  %v2927_v38 = vld [vmem:[%s3446_s29 + $0x10] sm:$0xff] }
  0xb6   :  { %141 = vrot.lane.b32.xlu0 %v2836_v41, %s2661_s21  ;;  %137 = vst.msk [vmem:[#allocation2] sm:$0xff] %vm71_vm0, %v2836_v41  ;;  %v112_v43 = vmul.f32 %v2048_v34, %v104_v42 }
  0xb8   :  { %v2842_v44 = vadd.f32 %v2049_v36, %v112_v43  ;;  %v2933_v43 = vld [vmem:[%s3446_s29 + $0x8] sm:$0xff] }
  0xba   :  { %159 = vrot.lane.b32.xlu0 %v2836_v41, %s2662_s1  ;;  %143 = vrot.lane.b32.xlu1 %v2842_v44, %s2661_s21  ;;  %138 = vst.msk [vmem:[#allocation2 + $0x8] sm:$0xff] %vm71_vm0, %v2842_v44 }
  0xbd   :  { %v168_v45 = vld [vmem:[#allocation2] sm:$0xff] }
  0xbe   :  { %150 = vrot.lane.b32.xlu1 %v2836_v41, %s2663_s22 }
  0xc1   :  { %v169_v46 = vld [vmem:[#allocation2 + $0x8] sm:$0xff] }
  0xc2   :  { %152 = vrot.lane.b32.xlu1 %v2842_v44, %s2663_s22  ;;  %v176_v47 = vpack.c.bf16 %v169_v46, %v168_v45 }
  0xc4   :  { %2295 = vmatprep.mubr.bf16.mxu0 %v176_v47  ;;  %v2940_v47 = vld [vmem:[%s3446_s29 + $0x18] sm:$0xff] }
  0xc6   :  { %161 = vrot.lane.b32.xlu1 %v2842_v44, %s2662_s1 }
 0x128   :  { %v142_v48 = vpop.permute.xlu0 %141 }
 0x129   :  { %148 = vst.msk [vmem:[#allocation2 + $0x10] sm:$0xff] %vm147_vm1, %v142_v48 }
 0x12c   :  { %v144_v49 = vpop.permute.xlu1 %143  ;;  %v160_v50 = vpop.permute.xlu0 %159 }
 0x12d   :  { %149 = vst.msk [vmem:[#allocation2 + $0x18] sm:$0xff] %vm147_vm1, %v144_v49 }
 0x12e   :  { %166 = vst.msk [vmem:[#allocation2 + $0x30] sm:$0xff] %vm165_vm2, %v160_v50 }
 0x130   :  { %v151_v51 = vpop.permute.xlu1 %150  ;;  %v170_v53 = vld [vmem:[#allocation2 + $0x10] sm:$0xff] }
 0x131   :  { %157 = vst.msk [vmem:[#allocation2 + $0x20] sm:$0xff] %vm156_vm3, %v151_v51 }
 0x134   :  { %v153_v52 = vpop.permute.xlu1 %152  ;;  %v171_v54 = vld [vmem:[#allocation2 + $0x18] sm:$0xff] }
 0x135   :  { %158 = vst.msk [vmem:[#allocation2 + $0x28] sm:$0xff] %vm156_vm3, %v153_v52  ;;  %v177_v55 = vpack.c.bf16 %v171_v54, %v170_v53  ;;  %v174_v60 = vld [vmem:[#allocation2 + $0x30] sm:$0xff] }
 0x137   :  { %2296 = vmatmul.mubr.bf16.vlgmr.msra.gmra.mxu0 %v177_v55  ;;  %v2949_v55 = vld [vmem:[%s3446_s29 + $0x20] sm:$0xff] }
 0x138   :  { %v162_v56 = vpop.permute.xlu1 %161  ;;  %v172_v57 = vld [vmem:[#allocation2 + $0x20] sm:$0xff] }
 0x139   :  { %167 = vst.msk [vmem:[#allocation2 + $0x38] sm:$0xff] %vm165_vm2, %v162_v56 }
 0x13c   :  { %v173_v58 = vld [vmem:[#allocation2 + $0x28] sm:$0xff] }
 0x13d   :  { %v178_v59 = vpack.c.bf16 %v173_v58, %v172_v57  ;;  %v2954_v57 = vld [vmem:[%s3446_s29 + $0x28] sm:$0xff] }
 0x13f   :  { %2299 = vmatprep.mubr.bf16.mxu0 %v178_v59 }
 0x140   :  { %v175_v61 = vld [vmem:[#allocation2 + $0x38] sm:$0xff] }
 0x141   :  { %v179_v62 = vpack.c.bf16 %v175_v61, %v174_v60  ;;  %v2961_v60 = vld [vmem:[%s3446_s29 + $0x30] sm:$0xff]  ;;  %v2966_v61 = vld [vmem:[%s3446_s29 + $0x38] sm:$0xff]  ;;  %s2665_s29 = smov 112  }
 0x143   :  { %2300 = vmatmul.mubr.bf16.gmra.mxu0 %v179_v62 }
 0x1f7   :  { %v2297_v63 = vpop.f32.mrf.mxu0 }
 0x1f8   :  { %v295_v25 = vadd.f32 %v2297_v63, %v198_v19 }
 0x1f9   :  { %v286_v0 = vpop.f32.mrf.mxu0 }
 0x1fa   :  { %v287_v5 = vadd.f32 %v286_v0, %v196_v1 }
 0x1fb   :  { %v2298_v2 = vpop.f32.mrf.mxu0 }
 0x1fc   :  { %v298_v21 = vadd.f32 %v2298_v2, %v199_v13 }
 0x1fd   :  { %v289_v4 = vpop.f32.mrf.mxu0 }
 0x1fe   :  { %v290_v6 = vadd.f32 %v289_v4, %v197_v3  ;;  %v2896_v27 = vpack.c.bf16 %v298_v21, %v295_v25 }
 0x200   :  { %v2868_v7 = vpack.c.bf16 %v290_v6, %v287_v5 }
 0x202   :  { %2311 = vmatprep.mubr.msk.bf16.mxu1 %vm333_vm4, %v2868_v7 }
 0x203   :  { %v2301_v9 = vpop.f32.mrf.mxu0 }
 0x204   :  { %v311_v17 = vadd.f32 %v2301_v9, %v202_v10 }
 0x205   :  { %v302_v11 = vpop.f32.mrf.mxu0 }
 0x206   :  { %v303_v22 = vadd.f32 %v302_v11, %v200_v14 }
 0x207   :  { %v2302_v15 = vpop.f32.mrf.mxu0 }
 0x208   :  { %v314_v18 = vadd.f32 %v2302_v15, %v203_v12 }
 0x209   :  { %v305_v20 = vpop.f32.mrf.mxu0 }
 0x20a   :  { %v2890_v23 = vpack.c.bf16 %v314_v18, %v311_v17  ;;  %v306_v24 = vadd.f32 %v305_v20, %v201_v16 }
 0x20c   :  { %v2892_v26 = vpack.c.bf16 %v306_v24, %v303_v22  ;;  %331 = vrot.lane.b32.xlu0 %v2890_v23, %s2664_s27 }
 0x20e   :  { %329 = vrot.lane.b32.xlu1 %v2892_v26, %s2664_s27 }
 0x210   :  { %327 = vrot.lane.b32.xlu0 %v2896_v27, %s2664_s27 }
 0x212   :  { %325 = vrot.lane.b32.xlu1 %v2868_v7, %s2664_s27 }
 0x27e   :  { %v332_v28 = vpop.permute.xlu0 %331 }
 0x27f   :  { %2479 = vmatprep.subr.msk.bf16.mxu1 %vm333_vm4, %v332_v28  ;;  %v356_v29 = vsel %vm333_vm4, %v332_v28, 0 }
 0x280   :  { %2304 = vmatpush3.bf16.xpose.msra.mxu1 %v356_v29  ;;  %v330_v30 = vpop.permute.xlu1 %329 }
 0x281   :  { %2480 = vmatprep.subr.msk.bf16.mxu1 %vm333_vm4, %v330_v30  ;;  %v353_v31 = vsel %vm333_vm4, %v330_v30, 0 }
 0x282   :  { %v328_v32 = vpop.permute.xlu0 %327 }
 0x283   :  { %v350_v33 = vsel %vm333_vm4, %v328_v32, 0 }
 0x284   :  { %v326_v34 = vpop.permute.xlu1 %325 }
 0x285   :  { %v347_v35 = vsel %vm333_vm4, %v326_v34, 0 }
 0x288   :  { %2306 = vmatpush3.bf16.xpose.msra.mxu1 %v353_v31 }
 0x289   :  { %2481 = vmatprep.subr.msk.bf16.mxu1 %vm333_vm4, %v328_v32 }
 0x290   :  { %2308 = vmatpush3.bf16.xpose.msra.mxu1 %v350_v33 }
 0x291   :  { %2482 = vmatprep.subr.msk.bf16.mxu1 %vm333_vm4, %v326_v34 }
 0x298   :  { %2310 = vmatpush3.bf16.xpose.msra.mxu1 %v347_v35 }
 0x299   :  { %2335 = vmatprep.subr.bf16.mxu1 %v2660_v8 }
 0x29f   :  { %2312 = vmatmul.mubr.msk.bf16.vlgmr.msra.gmra.mxu1 %vm333_vm4, %v2896_v27 }
 0x2a0   :  { %2315 = vmatprep.mubr.msk.bf16.mxu1 %vm333_vm4, %v2892_v26 }
 0x2a7   :  { %2316 = vmatmul.mubr.msk.bf16.gmra.mxu1 %vm333_vm4, %v2890_v23 }
 0x2a8   :  { %2339 = vmatprep.mubr.msk.bf16.mxu1 %vm2667_vm6, %v2660_v8 }
 0x35f   :  { %v2313_v36 = vpop.f32.mrf.mxu1 }
 0x360   :  { %v401_v45 = vadd.f32 %v2313_v36, %v2927_v38 }
 0x361   :  { %v392_v39 = vpop.f32.mrf.mxu1 }
 0x362   :  { %v393_v40 = vadd.f32 %v392_v39, %v2922_v37  ;;  %v430_v53 = vsel %vm423_vm5, %v401_v45, -inf }
 0x363   :  { %v2314_v42 = vpop.f32.mrf.mxu1 }
 0x364   :  { %v424_v46 = vsel %vm423_vm5, %v393_v40, -inf  ;;  %v404_v51 = vadd.f32 %v2314_v42, %v2940_v47 }
 0x365   :  { %v395_v48 = vpop.f32.mrf.mxu1  ;;  %425 = vmax.xlane.f32.xlu0 %v424_v46 }
 0x366   :  { %v396_v49 = vadd.f32 %v395_v48, %v2933_v43  ;;  %v433_v59 = vsel %vm423_vm5, %v404_v51, -inf }
 0x367   :  { %v2317_v50 = vpop.f32.mrf.mxu1 }
 0x368   :  { %v427_v52 = vsel %vm423_vm5, %v396_v49, -inf  ;;  %v417_v0 = vadd.f32 %v2317_v50, %v2961_v60 }
 0x369   :  { %v408_v54 = vpop.f32.mrf.mxu1  ;;  %428 = vmax.xlane.f32.xlu1 %v427_v52  ;;  %431 = vmax.xlane.f32.xlu0 %v430_v53 }
 0x36a   :  { %v409_v58 = vadd.f32 %v408_v54, %v2949_v55  ;;  %v442_v5 = vsel %vm423_vm5, %v417_v0, -inf }
 0x36b   :  { %v2318_v56 = vpop.f32.mrf.mxu1 }
 0x36c   :  { %v420_v1 = vadd.f32 %v2318_v56, %v2966_v61  ;;  %v436_v3 = vsel %vm423_vm5, %v409_v58, -inf }
 0x36d   :  { %v411_v62 = vpop.f32.mrf.mxu1  ;;  %434 = vmax.xlane.f32.xlu0 %v433_v59 }
 0x36e   :  { %v412_v63 = vadd.f32 %v411_v62, %v2954_v57  ;;  %v445_v4 = vsel %vm423_vm5, %v420_v1, -inf }
 0x370   :  { %v439_v2 = vsel %vm423_vm5, %v412_v63, -inf }
 0x371   :  { %440 = vmax.xlane.f32.xlu1 %v439_v2  ;;  %437 = vmax.xlane.f32.xlu0 %v436_v3 }
 0x375   :  { %446 = vmax.xlane.f32.xlu1 %v445_v4  ;;  %443 = vmax.xlane.f32.xlu0 %v442_v5 }
 0x3ee   :  { %v426_v6 = vpop.xlane.xlu0 %425 }
 0x3ef   :  { %v448_v9 = vsub.f32 %v393_v40, %v426_v6 }
 0x3f1   :  { %v456_v15 = vmul.f32 1.442695, %v448_v9 }
 0x3f2   :  { %v429_v10 = vpop.xlane.xlu1 %428  ;;  %v432_v11 = vpop.xlane.xlu0 %431 }
 0x3f3   :  { %v450_v12 = vsub.f32 %v401_v45, %v432_v11  ;;  %v449_v13 = vsub.f32 %v396_v49, %v429_v10 }
 0x3f5   :  { %v460_v14 = vmul.f32 1.442695, %v450_v12  ;;  %v458_v18 = vmul.f32 1.442695, %v449_v13 }
 0x3f6   :  { %v435_v16 = vpop.xlane.xlu0 %434 }
 0x3f7   :  { %v451_v17 = vsub.f32 %v404_v51, %v435_v16  ;;  %2546 = vpow2.f32 %v460_v14 }
 0x3f8   :  { %2548 = vpow2.f32 %v456_v15 }
 0x3f9   :  { %v462_v19 = vmul.f32 1.442695, %v451_v17 }
 0x3fa   :  { %v438_v20 = vpop.xlane.xlu0 %437  ;;  %v441_v46 = vpop.xlane.xlu1 %440 }
 0x3fb   :  { %2550 = vpow2.f32 %v462_v19  ;;  %v452_v21 = vsub.f32 %v409_v58, %v438_v20  ;;  %v453_v50 = vsub.f32 %v412_v63, %v441_v46 }
 0x3fc   :  { %2552 = vpow2.f32 %v458_v18 }
 0x3fd   :  { %v464_v28 = vmul.f32 1.442695, %v452_v21  ;;  %v466_v52 = vmul.f32 1.442695, %v453_v50 }
 0x3fe   :  { %v444_v22 = vpop.xlane.xlu0 %443  ;;  %v447_v48 = vpop.xlane.xlu1 %446 }
 0x3ff   :  { %v454_v24 = vsub.f32 %v417_v0, %v444_v22  ;;  %v455_v49 = vsub.f32 %v420_v1, %v447_v48 }
 0x401   :  { %v468_v25 = vmul.f32 1.442695, %v454_v24  ;;  %v470_v51 = vmul.f32 1.442695, %v455_v49 }
 0x403   :  { %2554 = vpow2.f32 %v468_v25 }
 0x404   :  { %v2975_v29 = vpop.eup %2546  ;;  %2556 = vpow2.f32 %v464_v28 }
 0x405   :  { %v478_v30 = vsel %vm423_vm5, %v2975_v29, 0.0  ;;  %v2549_v31 = vpop.eup %2548  ;;  %2558 = vpow2.f32 %v470_v51 }
 0x406   :  { %479 = vadd.xlane.f32.xlu0 %v478_v30  ;;  %v472_v35 = vsel %vm423_vm5, %v2549_v31, 0.0  ;;  %2560 = vpow2.f32 %v466_v52 }
 0x408   :  { %v2979_v32 = vpop.eup %2550 }
 0x409   :  { %v481_v33 = vsel %vm423_vm5, %v2979_v32, 0.0  ;;  %v2553_v34 = vpop.eup %2552 }
 0x40a   :  { %482 = vadd.xlane.f32.xlu1 %v481_v33  ;;  %473 = vadd.xlane.f32.xlu0 %v472_v35  ;;  %v475_v36 = vsel %vm423_vm5, %v2553_v34, 0.0  ;;  %v2507_v35 = vld [vmem:[%s3415_s6] sm:$0xff]  }
 0x40e   :  { %476 = vadd.xlane.f32.xlu1 %v475_v36 }
 0x410   :  { %v2985_v39 = vpop.eup %2554 }
 0x411   :  { %v490_v40 = vsel %vm423_vm5, %v2985_v39, 0.0  ;;  %v2989_v42 = vpop.eup %2556 }
 0x412   :  { %491 = vadd.xlane.f32.xlu0 %v490_v40  ;;  %v484_v45 = vsel %vm423_vm5, %v2989_v42, 0.0  ;;  %v2559_v53 = vpop.eup %2558 }
 0x413   :  { %v493_v54 = vsel %vm423_vm5, %v2559_v53, 0.0  ;;  %v2561_v56 = vpop.eup %2560 }
 0x416   :  { %485 = vadd.xlane.f32.xlu0 %v484_v45 }
 0x41f   :  { %520 = vrot.lane.b32.xlu1 %v2892_v26, %s2665_s29  ;;  %v487_v26 = vsel %vm423_vm5, %v2561_v56, 0.0 }
 0x423   :  { %518 = vrot.lane.b32.xlu1 %v2896_v27, %s2665_s29 }
 0x42c   :  { %522 = vrot.lane.b32.xlu0 %v2890_v23, %s2665_s29 }
 0x447   :  { %494 = vadd.xlane.f32.xlu1 %v493_v54 }
 0x44b   :  { %488 = vadd.xlane.f32.xlu1 %v487_v26 }
 0x45c   :  { %516 = vrot.lane.b32.xlu1 %v2868_v7, %s2665_s29 }
 0x48f   :  { %v480_v27 = vpop.xlane.xlu0 %479 }
 0x493   :  { %v483_v58 = vpop.xlane.xlu1 %482  ;;  %v474_v23 = vpop.xlane.xlu0 %473 }
 0x494   :  { %2562 = vrcp.f32 %v474_v23 }
 0x497   :  { %v477_v59 = vpop.xlane.xlu1 %476 }
 0x498   :  { %2564 = vrcp.f32 %v477_v59 }
 0x499   :  { %2566 = vrcp.f32 %v483_v58 }
 0x49a   :  { %2568 = vrcp.f32 %v480_v27 }
 0x49b   :  { %v492_v62 = vpop.xlane.xlu0 %491  ;;  %v521_v1 = vpop.permute.xlu1 %520 }
 0x49f   :  { %v486_v63 = vpop.xlane.xlu0 %485  ;;  %v519_v9 = vpop.permute.xlu1 %518 }
 0x4a1   :  { %v2563_v0 = vpop.eup %2562 }
 0x4a2   :  { %v504_v4 = vmul.f32 %v2563_v0, %v2549_v31  ;;  %v2506_v31 = vld [vmem:[%s3415_s6 + $0x8] sm:$0xff]  }
 0x4a3   :  { %v523_v2 = vpop.permute.xlu0 %522  ;;  %2336 = vmatpush3.bf16.msra.mxu1 %v2506_v31 }
 0x4a4   :  { %2319 = vmatprep.subr.bf16.mxu0 %v523_v2  ;;  %2337 = vmatprep.subr.bf16.mxu1 %v2660_v8 }
 0x4a5   :  { %v2565_v3 = vpop.eup %2564  ;;  %2320 = vmatpush3.bf16.msra.mxu0 %v523_v2 }
 0x4a6   :  { %v505_v5 = vmul.f32 %v2565_v3, %v2553_v34  ;;  %2321 = vmatprep.subr.bf16.mxu0 %v521_v1  ;;  %v2567_v10 = vpop.eup %2566 }
 0x4a7   :  { %v2569_v12 = vpop.eup %2568  ;;  %v507_v13 = vmul.f32 %v2567_v10, %v2979_v32  ;;  %2338 = vmatpush3.bf16.msra.mxu1 %v2507_v35  ;;  %v2071_v35 = vld [vmem:[%s3418_s9] ss:$0 sm:$0xff] }
 0x4a8   :  { %v512_v6 = vpack.c.bf16 %v505_v5, %v504_v4  ;;  %v506_v15 = vmul.f32 %v2569_v12, %v2975_v29  ;;  %2343 = vmatprep.subr.bf16.mxu1 %v2660_v8 }
 0x4a9   :  { %2322 = vmatpush3.bf16.msra.mxu0 %v521_v1 }
 0x4aa   :  { %2327 = vmatprep.mubr.msk.bf16.mxu0 %vm423_vm5, %v512_v6  ;;  %2323 = vmatprep.subr.bf16.mxu0 %v519_v9  ;;  %v513_v16 = vpack.c.bf16 %v507_v13, %v506_v15 }
 0x4ad   :  { %2324 = vmatpush3.bf16.msra.mxu0 %v519_v9  ;;  %v2509_v9 = vld [vmem:[%s3419_s10] sm:$0xff]  }
 0x4d0   :  { %v495_v7 = vpop.xlane.xlu1 %494 }
 0x4d1   :  { %2570 = vrcp.f32 %v495_v7 }
 0x4d2   :  { %2572 = vrcp.f32 %v486_v63 }
 0x4d3   :  { %2574 = vrcp.f32 %v492_v62 }
 0x4d4   :  { %v489_v11 = vpop.xlane.xlu1 %488 }
 0x4d5   :  { %2576 = vrcp.f32 %v489_v11 }
 0x4d8   :  { %v517_v14 = vpop.permute.xlu1 %516 }
 0x4d9   :  { %2325 = vmatprep.subr.bf16.mxu0 %v517_v14 }
 0x4da   :  { %2326 = vmatpush3.bf16.msra.mxu0 %v517_v14 }
 0x4db   :  { %2351 = vmatprep.subr.bf16.mxu0 %v2660_v8 }
 0x4dd   :  { %2328 = vmatmul.mubr.msk.bf16.vlgmr.msra.gmra.mxu0 %vm423_vm5, %v513_v16 }
 0x4de   :  { %v2571_v17 = vpop.eup %2570 }
 0x4df   :  { %v2573_v18 = vpop.eup %2572  ;;  %v511_v21 = vmul.f32 %v2571_v17, %v2559_v53 }
 0x4e0   :  { %v2575_v19 = vpop.eup %2574  ;;  %v508_v22 = vmul.f32 %v2573_v18, %v2989_v42 }
 0x4e1   :  { %v510_v25 = vmul.f32 %v2575_v19, %v2985_v39 }
 0x4e2   :  { %v2577_v20 = vpop.eup %2576 }
 0x4e3   :  { %v509_v24 = vmul.f32 %v2577_v20, %v2561_v56  ;;  %v515_v30 = vpack.c.bf16 %v511_v21, %v510_v25  ;;  %v2066_v56 = vld [vmem:[%s3416_s7] ss:$0 sm:$0xff] }
 0x4e5   :  { %v514_v28 = vpack.c.bf16 %v509_v24, %v508_v22 }
 0x4e7   :  { %2331 = vmatprep.mubr.msk.bf16.mxu0 %vm423_vm5, %v514_v28 }
 0x4e8   :  { %2332 = vmatmul.mubr.msk.bf16.gmra.mxu0 %vm423_vm5, %v515_v30 }
 0x4e9   :  { %2367 = vmatprep.mubr.msk.bf16.mxu0 %vm2667_vm6, %v2660_v8 }
 0x59d   :  { %v2329_v29 = vpop.f32.mrf.mxu0 }
 0x59e   :  { %609 = vrot.lane.b32.xlu0 %v2329_v29, %s2666_s25  ;;  %v2070_v29 = vld [vmem:[%s3417_s8] ss:$0 sm:$0xff] }
 0x59f   :  { %v574_v32 = vpop.f32.mrf.mxu0 }
 0x5a0   :  { %605 = vst.msk [vmem:[#allocation3] sm:$0xff] %vm333_vm4, %v574_v32 }
 0x5a1   :  { %v2330_v33 = vpop.f32.mrf.mxu0 }
 0x5a2   :  { %611 = vrot.lane.b32.xlu1 %v2330_v33, %s2666_s25 }
 0x5a3   :  { %v577_v34 = vpop.f32.mrf.mxu0 }
 0x5a4   :  { %606 = vst.msk [vmem:[#allocation3 + $0x8] sm:$0xff] %vm333_vm4, %v577_v34 }
 0x5a8   :  { %v2333_v36 = vpop.f32.mrf.mxu0 }
 0x5aa   :  { %v590_v39 = vpop.f32.mrf.mxu0 }
 0x5ab   :  { %620 = vrot.lane.b32.xlu0 %v590_v39, %s3435_s0 }
 0x5ac   :  { %v2334_v40 = vpop.f32.mrf.mxu0 }
 0x5ae   :  { %v593_v42 = vpop.f32.mrf.mxu0 }
 0x5af   :  { %631 = vrot.lane.b32.xlu0 %v2333_v36, %s3433_s23  ;;  %622 = vrot.lane.b32.xlu1 %v593_v42, %s3435_s0 }
 0x5b3   :  { %633 = vrot.lane.b32.xlu1 %v2334_v40, %s3433_s23 }
 0x610   :  { %v610_v45 = vpop.permute.xlu0 %609 }
 0x611   :  { %616 = vst.msk [vmem:[#allocation3] sm:$0xff] %vm615_vm7, %v610_v45  ;;  %v2510_v45 = vld [vmem:[%s3421_s12 + $0x38] sm:$0xff]  }
 0x612   :  { %2352 = vmatpush3.bf16.msra.mxu0 %v2510_v45 }
 0x613   :  { %2353 = vmatprep.subr.bf16.mxu0 %v2660_v8 }
 0x614   :  { %v612_v46 = vpop.permute.xlu1 %611 }
 0x615   :  { %617 = vst.msk [vmem:[#allocation3 + $0x8] sm:$0xff] %vm615_vm7, %v612_v46  ;;  %v2511_v46 = vld [vmem:[%s3421_s12 + $0x30] sm:$0xff]  }
 0x616   :  { %2354 = vmatpush3.bf16.msra.mxu0 %v2511_v46 }
 0x617   :  { %2355 = vmatprep.subr.bf16.mxu0 %v2660_v8 }
 0x61d   :  { %v621_v48 = vpop.permute.xlu0 %620 }
 0x61e   :  { %627 = vst.msk [vmem:[#allocation3] sm:$0xff] %vm626_vm8, %v621_v48  ;;  %v2512_v48 = vld [vmem:[%s3421_s12 + $0x28] sm:$0xff]  }
 0x61f   :  { %2356 = vmatpush3.bf16.msra.mxu0 %v2512_v48 }
 0x620   :  { %2357 = vmatprep.subr.bf16.mxu0 %v2660_v8 }
 0x621   :  { %v632_v49 = vpop.permute.xlu0 %631  ;;  %v623_v50 = vpop.permute.xlu1 %622 }
 0x622   :  { %638 = vst.msk [vmem:[#allocation3] sm:$0xff] %vm637_vm9, %v632_v49  ;;  %v2513_v49 = vld [vmem:[%s3421_s12 + $0x20] sm:$0xff]  }
 0x623   :  { %628 = vst.msk [vmem:[#allocation3 + $0x8] sm:$0xff] %vm626_vm8, %v623_v50  ;;  %2358 = vmatpush3.bf16.msra.mxu0 %v2513_v49  ;;  %v2514_v50 = vld [vmem:[%s3421_s12 + $0x18] sm:$0xff]  }
 0x624   :  { %2359 = vmatprep.subr.bf16.mxu0 %v2660_v8 }
 0x625   :  { %v634_v51 = vpop.permute.xlu1 %633 }
 0x626   :  { %639 = vst.msk [vmem:[#allocation3 + $0x8] sm:$0xff] %vm637_vm9, %v634_v51  ;;  %v2515_v51 = vld [vmem:[%s3421_s12 + $0x10] sm:$0xff]  }
 0x627   :  { %2360 = vmatpush3.bf16.msra.mxu0 %v2514_v50 }
 0x628   :  { %2361 = vmatprep.subr.bf16.mxu0 %v2660_v8 }
 0x629   :  { %v640_v52 = vld [vmem:[#allocation3] sm:$0xff] }
 0x62b   :  { %2362 = vmatpush3.bf16.msra.mxu0 %v2515_v51 }
 0x62c   :  { %2363 = vmatprep.subr.bf16.mxu0 %v2660_v8 }
 0x62d   :  { %v641_v53 = vld [vmem:[#allocation3 + $0x8] sm:$0xff] }
 0x62e   :  { %v642_v54 = vpack.c.bf16 %v641_v53, %v640_v52  ;;  %v2516_v52 = vld [vmem:[%s3421_s12 + $0x8] sm:$0xff]   ;;  %v2517_v53 = vld [vmem:[%s3421_s12] sm:$0xff]  }
 0x62f   :  { %2364 = vmatpush3.bf16.msra.mxu0 %v2516_v52 }
 0x630   :  { %2340 = vmatmul.mubr.msk.bf16.vlgmr.msra.gmra.mxu1 %vm71_vm0, %v642_v54  ;;  %2365 = vmatprep.subr.bf16.mxu0 %v2660_v8  ;;  %v2072_v54 = vld [vmem:[%s3420_s11] ss:$0 sm:$0xff] }
 0x631   :  { %2347 = vmatprep.mubr.msk.bf16.mxu1 %vm2667_vm6, %v2660_v8 }
 0x633   :  { %2366 = vmatpush3.bf16.msra.mxu0 %v2517_v53 }
 0x6f0   :  { %v703_v26 = vpop.f32.mrf.mxu1 }
 0x6f1   :  { %v704_v27 = vadd.f32 %v2066_v56, %v703_v26 }
 0x6f2   :  { %v2341_v58 = vpop.f32.mrf.mxu1 }
 0x6f3   :  { %v710_v23 = vadd.f32 %v704_v27, %v2836_v41  ;;  %v2508_v41 = vld [vmem:[%s3419_s10 + $0x8] sm:$0xff]  }
 0x6f4   :  { %v706_v59 = vpop.f32.mrf.mxu1  ;;  %2344 = vmatpush3.bf16.msra.mxu1 %v2508_v41 }
 0x6f5   :  { %v707_v62 = vadd.f32 %v2066_v56, %v706_v59  ;;  %v714_v63 = vsel %vm71_vm0, %v710_v23, 0.0  ;;  %v722_v0 = vmul.f32 %v710_v23, %v710_v23  ;;  %2345 = vmatprep.subr.bf16.mxu1 %v2660_v8 }
 0x6f6   :  { %715 = vadd.xlane.f32.xlu0 %v714_v63  ;;  %v2342_v1 = vpop.f32.mrf.mxu1 }
 0x6f7   :  { %v711_v2 = vadd.f32 %v707_v62, %v2842_v44  ;;  %v724_v3 = vsel %vm71_vm0, %v722_v0, 0.0 }
 0x6f8   :  { %2346 = vmatpush3.bf16.msra.mxu1 %v2509_v9 }
 0x6f9   :  { %v717_v4 = vsel %vm71_vm0, %v711_v2, 0.0  ;;  %v723_v5 = vmul.f32 %v711_v2, %v711_v2 }
 0x6fa   :  { %725 = vadd.xlane.f32.xlu0 %v724_v3  ;;  %718 = vadd.xlane.f32.xlu1 %v717_v4 }
 0x6fb   :  { %v727_v6 = vsel %vm71_vm0, %v723_v5, 0.0 }
 0x6fe   :  { %728 = vadd.xlane.f32.xlu0 %v727_v6 }
 0x77f   :  { %v716_v44 = vpop.xlane.xlu0 %715 }
 0x780   :  { %v720_v7 = vmul.f32 0.03125, %v716_v44 }
 0x782   :  { %v732_v12 = vmul.f32 %v720_v7, %v720_v7  ;;  %v738_v25 = vsub.f32 %v710_v23, %v720_v7 }
 0x783   :  { %v726_v10 = vpop.xlane.xlu0 %725  ;;  %v719_v11 = vpop.xlane.xlu1 %718 }
 0x784   :  { %v730_v13 = vmul.f32 0.03125, %v726_v10  ;;  %v721_v14 = vmul.f32 0.03125, %v719_v11 }
 0x786   :  { %v734_v15 = vsub.f32 %v730_v13, %v732_v12  ;;  %v733_v18 = vmul.f32 %v721_v14, %v721_v14  ;;  %v739_v31 = vsub.f32 %v711_v2, %v721_v14 }
 0x787   :  { %v729_v16 = vpop.xlane.xlu0 %728 }
 0x788   :  { %v736_v17 = vmax.f32 %v734_v15, 0.0  ;;  %v731_v19 = vmul.f32 0.03125, %v729_v16  ;;  %v2076_v16 = vld [vmem:[%s3422_s13] ss:$0 sm:$0xff] }
 0x78a   :  { %v740_v20 = vadd.f32 1e-12, %v736_v17  ;;  %v735_v21 = vsub.f32 %v731_v19, %v733_v18 }
 0x78c   :  { %2578 = vrsqrt.f32 %v740_v20  ;;  %v737_v22 = vmax.f32 %v735_v21, 0.0 }
 0x78e   :  { %v741_v24 = vadd.f32 1e-12, %v737_v22 }
 0x790   :  { %2580 = vrsqrt.f32 %v741_v24 }
 0x799   :  { %v2579_v28 = vpop.eup %2578 }
 0x79a   :  { %v744_v30 = vmul.f32 %v2579_v28, %v738_v25 }
 0x79c   :  { %v752_v34 = vmul.f32 %v2070_v29, %v744_v30 }
 0x79d   :  { %v2581_v32 = vpop.eup %2580 }
 0x79e   :  { %v745_v33 = vmul.f32 %v2581_v32, %v739_v31  ;;  %v760_v39 = vadd.f32 %v2071_v35, %v752_v34  ;;  %v2518_v34 = vld [vmem:[%s3443_s26 + $0x78] sm:$0xff]  }
 0x79f   :  { %2371 = vmatprep.subr.bf16.mxu1 %v2518_v34 }
 0x7a0   :  { %v753_v36 = vmul.f32 %v2070_v29, %v745_v33 }
 0x7a2   :  { %v3063_v40 = vadd.f32 %v2071_v35, %v753_v36  ;;  %v2519_v35 = vld [vmem:[%s3443_s26 + $0x70] sm:$0xff]   ;;  %v2520_v36 = vld [vmem:[%s3443_s26 + $0x68] sm:$0xff]  }
 0x7a4   :  { %v762_v42 = vpack.c.bf16 %v3063_v40, %v760_v39 }
 0x7a6   :  { %2348 = vmatmul.mubr.msk.bf16.vlgmr.msra.gmra.mxu1 %vm71_vm0, %v762_v42 }
 0x7a7   :  { %2372 = vmatpush3.bf16.msra.mxu1 %v2518_v34 }
 0x7a8   :  { %2373 = vmatprep.subr.bf16.mxu1 %v2519_v35 }
 0x7ab   :  { %2374 = vmatpush3.bf16.msra.mxu1 %v2519_v35  ;;  %v2103_v35 = vld [vmem:[%s3414_s5 + $0x40] sm:$0xff] }
 0x7ac   :  { %2375 = vmatprep.subr.bf16.mxu1 %v2520_v36 }
 0x7af   :  { %2376 = vmatpush3.bf16.msra.mxu1 %v2520_v36 }
 0x866   :  { %v823_v56 = vpop.f32.mrf.mxu1 }
 0x867   :  { %v824_v26 = vadd.f32 %v2072_v54, %v823_v56 }
 0x868   :  { %v2349_v27 = vpop.f32.mrf.mxu1 }
 0x869   :  { %v832_v58 = vmul.f32 0.044715, %v824_v26  ;;  %v830_v10 = vmul.f32 0.5, %v824_v26 }
 0x86a   :  { %v826_v23 = vpop.f32.mrf.mxu1 }
 0x86b   :  { %v834_v59 = vmul.f32 %v832_v58, %v824_v26  ;;  %v827_v62 = vadd.f32 %v2072_v54, %v826_v23 }
 0x86c   :  { %v2350_v63 = vpop.f32.mrf.mxu1 }
 0x86d   :  { %v836_v0 = vmul.f32 %v834_v59, %v824_v26  ;;  %v833_v1 = vmul.f32 0.044715, %v827_v62  ;;  %v831_v11 = vmul.f32 0.5, %v827_v62  ;;  %v2524_v63 = vld [vmem:[%s3443_s26 + $0x48] sm:$0xff]  }
 0x86f   :  { %v838_v2 = vadd.f32 %v836_v0, %v824_v26  ;;  %v835_v3 = vmul.f32 %v833_v1, %v827_v62 }
 0x871   :  { %v840_v4 = vmul.f32 0.7978845, %v838_v2  ;;  %v837_v5 = vmul.f32 %v835_v3, %v827_v62  ;;  %v2085_v2 = vld [vmem:[%s3423_s14] ss:$0 sm:$0xff] }
 0x873   :  { %2582 = vtanh.f32 %v840_v4  ;;  %v839_v6 = vadd.f32 %v837_v5, %v827_v62  ;;  %v2523_v62 = vld [vmem:[%s3443_s26 + $0x50] sm:$0xff]   ;;  %v2086_v4 = vld [vmem:[%s3424_s15] ss:$0 sm:$0xff] }
 0x874   :  { %v2525_v5 = vld [vmem:[%s3443_s26 + $0x40] sm:$0xff]  }
 0x875   :  { %v841_v41 = vmul.f32 0.7978845, %v839_v6 }
 0x877   :  { %2584 = vtanh.f32 %v841_v41 }
 0x880   :  { %v2583_v9 = vpop.eup %2582 }
 0x881   :  { %v844_v44 = vadd.f32 1.0, %v2583_v9 }
 0x883   :  { %v846_v13 = vmul.f32 %v844_v44, %v830_v10 }
 0x884   :  { %v2585_v7 = vpop.eup %2584 }
 0x885   :  { %v845_v12 = vadd.f32 1.0, %v2585_v7 }
 0x887   :  { %v847_v14 = vmul.f32 %v845_v12, %v831_v11 }
 0x889   :  { %v848_v15 = vpack.c.bf16 %v847_v14, %v846_v13 }
 0x88b   :  { %2368 = vmatmul.mubr.bf16.vlgmr.msra.gmra.mxu0 %v848_v15 }
 0x94b   :  { %v954_v17 = vpop.f32.mrf.mxu0 }
 0x94c   :  { %v955_v18 = vadd.f32 %v2076_v16, %v954_v17 }
 0x94d   :  { %v2369_v19 = vpop.f32.mrf.mxu0 }
 0x94e   :  { %v961_v20 = vadd.f32 %v955_v18, %v760_v39  ;;  %v2521_v39 = vld [vmem:[%s3443_s26 + $0x60] sm:$0xff]  }
 0x94f   :  { %v957_v21 = vpop.f32.mrf.mxu0  ;;  %2377 = vmatprep.subr.bf16.mxu1 %v2521_v39 }
 0x950   :  { %v958_v22 = vadd.f32 %v2076_v16, %v957_v21  ;;  %v965_v24 = vsel %vm71_vm0, %v961_v20, 0.0  ;;  %v973_v25 = vmul.f32 %v961_v20, %v961_v20  ;;  %2378 = vmatpush3.bf16.msra.mxu1 %v2521_v39  ;;  %v2104_v39 = vld [vmem:[%s3414_s5 + $0x48] sm:$0xff] }
 0x951   :  { %966 = vadd.xlane.f32.xlu0 %v965_v24  ;;  %v2370_v28 = vpop.f32.mrf.mxu0 }
 0x952   :  { %v962_v30 = vadd.f32 %v958_v22, %v3063_v40  ;;  %v975_v29 = vsel %vm71_vm0, %v973_v25, 0.0  ;;  %v2522_v40 = vld [vmem:[%s3443_s26 + $0x58] sm:$0xff]  }
 0x953   :  { %2379 = vmatprep.subr.bf16.mxu1 %v2522_v40 }
 0x954   :  { %v968_v31 = vsel %vm71_vm0, %v962_v30, 0.0  ;;  %v974_v32 = vmul.f32 %v962_v30, %v962_v30  ;;  %2380 = vmatpush3.bf16.msra.mxu1 %v2522_v40 }
 0x955   :  { %976 = vadd.xlane.f32.xlu0 %v975_v29  ;;  %969 = vadd.xlane.f32.xlu1 %v968_v31 }
 0x956   :  { %v978_v33 = vsel %vm71_vm0, %v974_v32, 0.0  ;;  %2381 = vmatprep.subr.bf16.mxu1 %v2523_v62 }
 0x958   :  { %2382 = vmatpush3.bf16.msra.mxu1 %v2523_v62 }
 0x959   :  { %979 = vadd.xlane.f32.xlu1 %v978_v33  ;;  %2383 = vmatprep.subr.bf16.mxu1 %v2524_v63 }
 0x95c   :  { %2384 = vmatpush3.bf16.msra.mxu1 %v2524_v63 }
 0x95d   :  { %2385 = vmatprep.subr.bf16.mxu1 %v2525_v5 }
 0x960   :  { %2386 = vmatpush3.bf16.msra.mxu1 %v2525_v5 }
 0x9da   :  { %v967_v42 = vpop.xlane.xlu0 %966 }
 0x9db   :  { %v971_v45 = vmul.f32 0.03125, %v967_v42 }
 0x9dd   :  { %v983_v49 = vmul.f32 %v971_v45, %v971_v45  ;;  %v989_v0 = vsub.f32 %v961_v20, %v971_v45 }
 0x9de   :  { %v977_v46 = vpop.xlane.xlu0 %976  ;;  %v970_v48 = vpop.xlane.xlu1 %969 }
 0x9df   :  { %v981_v50 = vmul.f32 0.03125, %v977_v46  ;;  %v972_v51 = vmul.f32 0.03125, %v970_v48 }
 0x9e1   :  { %v985_v52 = vsub.f32 %v981_v50, %v983_v49  ;;  %v984_v56 = vmul.f32 %v972_v51, %v972_v51  ;;  %v990_v6 = vsub.f32 %v962_v30, %v972_v51  ;;  %v2109_v49 = vld [vmem:[%s3414_s5 + $0x70] sm:$0xff]  ;;  %v2110_v51 = vld [vmem:[%s3414_s5 + $0x78] sm:$0xff] }
 0x9e2   :  { %v980_v53 = vpop.xlane.xlu1 %979 }
 0x9e3   :  { %v987_v54 = vmax.f32 %v985_v52, 0.0  ;;  %v982_v26 = vmul.f32 0.03125, %v980_v53  ;;  %v2106_v52 = vld [vmem:[%s3414_s5 + $0x58] sm:$0xff]  ;;  %v2107_v53 = vld [vmem:[%s3414_s5 + $0x60] sm:$0xff] }
 0x9e5   :  { %v991_v27 = vadd.f32 1e-12, %v987_v54  ;;  %v986_v58 = vsub.f32 %v982_v26, %v984_v56  ;;  %v2108_v56 = vld [vmem:[%s3414_s5 + $0x68] sm:$0xff] }
 0x9e7   :  { %2586 = vrsqrt.f32 %v991_v27  ;;  %v988_v23 = vmax.f32 %v986_v58, 0.0  ;;  %v2105_v58 = vld [vmem:[%s3414_s5 + $0x50] sm:$0xff] }
 0x9e9   :  { %v992_v59 = vadd.f32 1e-12, %v988_v23 }
 0x9eb   :  { %2588 = vrsqrt.f32 %v992_v59 }
 0x9f4   :  { %v2587_v1 = vpop.eup %2586 }
 0x9f5   :  { %v995_v3 = vmul.f32 %v2587_v1, %v989_v0 }
 0x9f7   :  { %v1003_v41 = vmul.f32 %v2085_v2, %v995_v3 }
 0x9f8   :  { %v2589_v9 = vpop.eup %2588 }
 0x9f9   :  { %v3139_v44 = vadd.f32 %v2086_v4, %v1003_v41  ;;  %v996_v7 = vmul.f32 %v2589_v9, %v990_v6 }
 0x9fb   :  { %1017 = vrot.lane.b32.xlu0 %v3139_v44, %s2661_s21  ;;  %1013 = vst.msk [vmem:[#allocation2] sm:$0xff] %vm71_vm0, %v3139_v44  ;;  %1025 = vrot.lane.b32.xlu1 %v3139_v44, %s2663_s22  ;;  %v1004_v10 = vmul.f32 %v2085_v2, %v996_v7 }
 0x9fd   :  { %v3147_v11 = vadd.f32 %v2086_v4, %v1004_v10 }
 0x9ff   :  { %1033 = vrot.lane.b32.xlu0 %v3139_v44, %s2662_s1  ;;  %1019 = vrot.lane.b32.xlu1 %v3147_v11, %s2661_s21  ;;  %1014 = vst.msk [vmem:[#allocation2 + $0x8] sm:$0xff] %vm71_vm0, %v3147_v11 }
 0xa02   :  { %v1041_v12 = vld [vmem:[#allocation2] sm:$0xff] }
 0xa03   :  { %1027 = vrot.lane.b32.xlu1 %v3147_v11, %s2663_s22 }
 0xa06   :  { %v1042_v13 = vld [vmem:[#allocation2 + $0x8] sm:$0xff] }
 0xa07   :  { %1035 = vrot.lane.b32.xlu1 %v3147_v11, %s2662_s1  ;;  %v1049_v14 = vpack.c.bf16 %v1042_v13, %v1041_v12 }
 0xa09   :  { %2387 = vmatprep.mubr.bf16.mxu1 %v1049_v14 }
 0xa6d   :  { %v1018_v15 = vpop.permute.xlu0 %1017  ;;  %v1026_v16 = vpop.permute.xlu1 %1025 }
 0xa6e   :  { %1023 = vst.msk [vmem:[#allocation2 + $0x10] sm:$0xff] %vm147_vm1, %v1018_v15 }
 0xa6f   :  { %1031 = vst.msk [vmem:[#allocation2 + $0x20] sm:$0xff] %vm156_vm3, %v1026_v16 }
 0xa71   :  { %v1034_v17 = vpop.permute.xlu0 %1033  ;;  %v1020_v18 = vpop.permute.xlu1 %1019 }
 0xa72   :  { %1039 = vst.msk [vmem:[#allocation2 + $0x30] sm:$0xff] %vm165_vm2, %v1034_v17 }
 0xa73   :  { %1024 = vst.msk [vmem:[#allocation2 + $0x18] sm:$0xff] %vm147_vm1, %v1020_v18 }
 0xa75   :  { %v1028_v19 = vpop.permute.xlu1 %1027  ;;  %v1043_v21 = vld [vmem:[#allocation2 + $0x10] sm:$0xff] }
 0xa76   :  { %1032 = vst.msk [vmem:[#allocation2 + $0x28] sm:$0xff] %vm156_vm3, %v1028_v19  ;;  %v1045_v25 = vld [vmem:[#allocation2 + $0x20] sm:$0xff] }
 0xa79   :  { %v1036_v20 = vpop.permute.xlu1 %1035  ;;  %v1047_v29 = vld [vmem:[#allocation2 + $0x30] sm:$0xff] }
 0xa7a   :  { %v1044_v22 = vld [vmem:[#allocation2 + $0x18] sm:$0xff]  ;;  %1040 = vst.msk [vmem:[#allocation2 + $0x38] sm:$0xff] %vm165_vm2, %v1036_v20 }
 0xa7b   :  { %v1050_v24 = vpack.c.bf16 %v1044_v22, %v1043_v21 }
 0xa7d   :  { %2388 = vmatmul.mubr.bf16.vlgmr.msra.gmra.mxu1 %v1050_v24  ;;  %v1046_v28 = vld [vmem:[#allocation2 + $0x28] sm:$0xff] }
 0xa7e   :  { %v1051_v30 = vpack.c.bf16 %v1046_v28, %v1045_v25 }
 0xa80   :  { %2391 = vmatprep.mubr.bf16.mxu1 %v1051_v30 }
 0xa81   :  { %v1048_v31 = vld [vmem:[#allocation2 + $0x38] sm:$0xff] }
 0xa82   :  { %v1052_v32 = vpack.c.bf16 %v1048_v31, %v1047_v29 }
 0xa85   :  { %2392 = vmatmul.mubr.bf16.gmra.mxu1 %v1052_v32 }
 0xb3d   :  { %v2389_v33 = vpop.f32.mrf.mxu1 }
 0xb3e   :  { %v1170_v1 = vadd.f32 %v2389_v33, %v2105_v58 }
 0xb3f   :  { %v1161_v34 = vpop.f32.mrf.mxu1 }
 0xb40   :  { %v1162_v42 = vadd.f32 %v2103_v35, %v1161_v34 }
 0xb41   :  { %v2390_v36 = vpop.f32.mrf.mxu1 }
 0xb42   :  { %v1173_v59 = vadd.f32 %v2390_v36, %v2106_v52 }
 0xb43   :  { %v1164_v40 = vpop.f32.mrf.mxu1 }
 0xb44   :  { %v1165_v45 = vadd.f32 %v2104_v39, %v1164_v40  ;;  %v3199_v3 = vpack.c.bf16 %v1173_v59, %v1170_v1 }
 0xb45   :  { %v2393_v46 = vpop.f32.mrf.mxu1 }
 0xb46   :  { %v3171_v48 = vpack.c.bf16 %v1165_v45, %v1162_v42  ;;  %v1186_v26 = vadd.f32 %v2393_v46, %v2109_v49 }
 0xb47   :  { %v1177_v50 = vpop.f32.mrf.mxu1 }
 0xb48   :  { %2403 = vmatprep.mubr.msk.bf16.mxu0 %vm333_vm4, %v3171_v48  ;;  %v1178_v62 = vadd.f32 %v2107_v53, %v1177_v50 }
 0xb49   :  { %v2394_v54 = vpop.f32.mrf.mxu1 }
 0xb4a   :  { %v1189_v27 = vadd.f32 %v2394_v54, %v2110_v51 }
 0xb4b   :  { %v1180_v23 = vpop.f32.mrf.mxu1 }
 0xb4c   :  { %v3193_v63 = vpack.c.bf16 %v1189_v27, %v1186_v26  ;;  %v1181_v0 = vadd.f32 %v2108_v56, %v1180_v23 }
 0xb4e   :  { %v3195_v2 = vpack.c.bf16 %v1181_v0, %v1178_v62  ;;  %1206 = vrot.lane.b32.xlu0 %v3193_v63, %s2664_s27 }
 0xb50   :  { %1204 = vrot.lane.b32.xlu1 %v3195_v2, %s2664_s27 }
 0xb52   :  { %1202 = vrot.lane.b32.xlu0 %v3199_v3, %s2664_s27 }
 0xb54   :  { %1200 = vrot.lane.b32.xlu1 %v3171_v48, %s2664_s27 }
 0xbc0   :  { %v1207_v4 = vpop.permute.xlu0 %1206 }
 0xbc1   :  { %v1230_v5 = vsel %vm333_vm4, %v1207_v4, 0  ;;  %2483 = vmatprep.subr.msk.bf16.mxu0 %vm333_vm4, %v1207_v4 }
 0xbc2   :  { %2396 = vmatpush3.bf16.xpose.msra.mxu0 %v1230_v5  ;;  %v1205_v6 = vpop.permute.xlu1 %1204 }
 0xbc3   :  { %2484 = vmatprep.subr.msk.bf16.mxu0 %vm333_vm4, %v1205_v6  ;;  %v1227_v41 = vsel %vm333_vm4, %v1205_v6, 0 }
 0xbc4   :  { %v1203_v9 = vpop.permute.xlu0 %1202 }
 0xbc5   :  { %v1224_v7 = vsel %vm333_vm4, %v1203_v9, 0 }
 0xbc6   :  { %v1201_v10 = vpop.permute.xlu1 %1200 }
 0xbc7   :  { %v1221_v12 = vsel %vm333_vm4, %v1201_v10, 0 }
 0xbca   :  { %2398 = vmatpush3.bf16.xpose.msra.mxu0 %v1227_v41 }
 0xbcb   :  { %2485 = vmatprep.subr.msk.bf16.mxu0 %vm333_vm4, %v1203_v9 }
 0xbd2   :  { %2400 = vmatpush3.bf16.xpose.msra.mxu0 %v1224_v7 }
 0xbd3   :  { %2486 = vmatprep.subr.msk.bf16.mxu0 %vm333_vm4, %v1201_v10 }
 0xbda   :  { %2402 = vmatpush3.bf16.xpose.msra.mxu0 %v1221_v12 }
 0xbdb   :  { %2435 = vmatprep.subr.bf16.mxu0 %v2660_v8 }
 0xbe1   :  { %2404 = vmatmul.mubr.msk.bf16.vlgmr.msra.gmra.mxu0 %vm333_vm4, %v3199_v3 }
 0xbe2   :  { %2407 = vmatprep.mubr.msk.bf16.mxu0 %vm333_vm4, %v3195_v2 }
 0xbe9   :  { %2408 = vmatmul.mubr.msk.bf16.gmra.mxu0 %vm333_vm4, %v3193_v63 }
 0xbea   :  { %2439 = vmatprep.mubr.msk.bf16.mxu0 %vm2667_vm6, %v2660_v8 }
 0xca1   :  { %v2405_v13 = vpop.f32.mrf.mxu0 }
 0xca2   :  { %v1275_v17 = vadd.f32 %v2405_v13, %v2927_v38 }
 0xca3   :  { %v1266_v14 = vpop.f32.mrf.mxu0 }
 0xca4   :  { %v1267_v15 = vadd.f32 %v1266_v14, %v2922_v37  ;;  %v1303_v25 = vsel %vm423_vm5, %v1275_v17, -inf }
 0xca5   :  { %v2406_v16 = vpop.f32.mrf.mxu0 }
 0xca6   :  { %v1297_v18 = vsel %vm423_vm5, %v1267_v15, -inf  ;;  %v1278_v22 = vadd.f32 %v2406_v16, %v2940_v47 }
 0xca7   :  { %v1269_v19 = vpop.f32.mrf.mxu0  ;;  %1298 = vmax.xlane.f32.xlu0 %v1297_v18 }
 0xca8   :  { %v1270_v20 = vadd.f32 %v1269_v19, %v2933_v43  ;;  %v1306_v38 = vsel %vm423_vm5, %v1278_v22, -inf }
 0xca9   :  { %v2409_v21 = vpop.f32.mrf.mxu0 }
 0xcaa   :  { %v1300_v24 = vsel %vm423_vm5, %v1270_v20, -inf  ;;  %v1291_v43 = vadd.f32 %v2409_v21, %v2961_v60 }
 0xcab   :  { %v1282_v28 = vpop.f32.mrf.mxu0  ;;  %1301 = vmax.xlane.f32.xlu1 %v1300_v24  ;;  %1304 = vmax.xlane.f32.xlu0 %v1303_v25 }
 0xcac   :  { %v1283_v30 = vadd.f32 %v1282_v28, %v2949_v55  ;;  %v1315_v55 = vsel %vm423_vm5, %v1291_v43, -inf }
 0xcad   :  { %v2410_v37 = vpop.f32.mrf.mxu0 }
 0xcae   :  { %v1294_v47 = vadd.f32 %v2410_v37, %v2966_v61  ;;  %v1309_v33 = vsel %vm423_vm5, %v1283_v30, -inf }
 0xcaf   :  { %v1285_v29 = vpop.f32.mrf.mxu0  ;;  %1307 = vmax.xlane.f32.xlu0 %v1306_v38 }
 0xcb0   :  { %v1286_v31 = vadd.f32 %v1285_v29, %v2954_v57  ;;  %v1318_v34 = vsel %vm423_vm5, %v1294_v47, -inf }
 0xcb2   :  { %v1312_v32 = vsel %vm423_vm5, %v1286_v31, -inf }
 0xcb3   :  { %1313 = vmax.xlane.f32.xlu1 %v1312_v32  ;;  %1310 = vmax.xlane.f32.xlu0 %v1309_v33 }
 0xcb7   :  { %1319 = vmax.xlane.f32.xlu1 %v1318_v34  ;;  %1316 = vmax.xlane.f32.xlu0 %v1315_v55 }
 0xd30   :  { %v1299_v35 = vpop.xlane.xlu0 %1298 }
 0xd31   :  { %v1321_v36 = vsub.f32 %v1267_v15, %v1299_v35 }
 0xd33   :  { %v1329_v61 = vmul.f32 1.442695, %v1321_v36 }
 0xd34   :  { %v1302_v39 = vpop.xlane.xlu1 %1301  ;;  %v1305_v57 = vpop.xlane.xlu0 %1304 }
 0xd35   :  { %v1323_v40 = vsub.f32 %v1275_v17, %v1305_v57  ;;  %v1322_v60 = vsub.f32 %v1270_v20, %v1302_v39 }
 0xd37   :  { %v1333_v42 = vmul.f32 1.442695, %v1323_v40  ;;  %v1331_v49 = vmul.f32 1.442695, %v1322_v60 }
 0xd38   :  { %v1308_v45 = vpop.xlane.xlu0 %1307 }
 0xd39   :  { %v1324_v46 = vsub.f32 %v1278_v22, %v1308_v45  ;;  %2590 = vpow2.f32 %v1333_v42 }
 0xd3a   :  { %2592 = vpow2.f32 %v1329_v61 }
 0xd3b   :  { %v1335_v50 = vmul.f32 1.442695, %v1324_v46 }
 0xd3c   :  { %v1311_v51 = vpop.xlane.xlu0 %1310  ;;  %v1314_v7 = vpop.xlane.xlu1 %1313 }
 0xd3d   :  { %2594 = vpow2.f32 %v1335_v50  ;;  %v1325_v52 = vsub.f32 %v1283_v30, %v1311_v51  ;;  %v1326_v13 = vsub.f32 %v1286_v31, %v1314_v7  ;;  %v2526_v51 = vld [vmem:[%s3415_s6 + $0x18] sm:$0xff]   ;;  %v2132_v7 = vld [vmem:[%s3416_s7 + $0x1] ss:$0 sm:$0xff] }
 0xd3e   :  { %2596 = vpow2.f32 %v1331_v49 }
 0xd3f   :  { %v1337_v26 = vmul.f32 1.442695, %v1325_v52  ;;  %v1339_v15 = vmul.f32 1.442695, %v1326_v13 }
 0xd40   :  { %v1317_v53 = vpop.xlane.xlu0 %1316  ;;  %v1320_v10 = vpop.xlane.xlu1 %1319 }
 0xd41   :  { %v1327_v54 = vsub.f32 %v1291_v43, %v1317_v53  ;;  %v1328_v12 = vsub.f32 %v1294_v47, %v1320_v10 }
 0xd43   :  { %v1341_v56 = vmul.f32 1.442695, %v1327_v54  ;;  %v1343_v14 = vmul.f32 1.442695, %v1328_v12 }
 0xd45   :  { %2598 = vpow2.f32 %v1341_v56  ;;  %v2527_v56 = vld [vmem:[%s3415_s6 + $0x10] sm:$0xff]  }
 0xd46   :  { %v3240_v27 = vpop.eup %2590  ;;  %2600 = vpow2.f32 %v1337_v26 }
 0xd47   :  { %v1351_v58 = vsel %vm423_vm5, %v3240_v27, 0.0  ;;  %v2593_v23 = vpop.eup %2592  ;;  %2602 = vpow2.f32 %v1343_v14 }
 0xd48   :  { %1352 = vadd.xlane.f32.xlu0 %v1351_v58  ;;  %v1345_v1 = vsel %vm423_vm5, %v2593_v23, 0.0  ;;  %2604 = vpow2.f32 %v1339_v15 }
 0xd4a   :  { %v3244_v59 = vpop.eup %2594 }
 0xd4b   :  { %v1354_v62 = vsel %vm423_vm5, %v3244_v59, 0.0  ;;  %v2597_v0 = vpop.eup %2596 }
 0xd4c   :  { %1355 = vadd.xlane.f32.xlu1 %v1354_v62  ;;  %1346 = vadd.xlane.f32.xlu0 %v1345_v1  ;;  %v1348_v4 = vsel %vm423_vm5, %v2597_v0, 0.0 }
 0xd50   :  { %1349 = vadd.xlane.f32.xlu1 %v1348_v4 }
 0xd52   :  { %v3250_v5 = vpop.eup %2598 }
 0xd53   :  { %v1363_v6 = vsel %vm423_vm5, %v3250_v5, 0.0  ;;  %v3254_v41 = vpop.eup %2600 }
 0xd54   :  { %1364 = vadd.xlane.f32.xlu0 %v1363_v6  ;;  %v1357_v9 = vsel %vm423_vm5, %v3254_v41, 0.0  ;;  %v2603_v16 = vpop.eup %2602 }
 0xd55   :  { %v1366_v17 = vsel %vm423_vm5, %v2603_v16, 0.0  ;;  %v2605_v18 = vpop.eup %2604 }
 0xd58   :  { %1358 = vadd.xlane.f32.xlu0 %v1357_v9 }
 0xd61   :  { %1393 = vrot.lane.b32.xlu1 %v3195_v2, %s2665_s29  ;;  %v1360_v2 = vsel %vm423_vm5, %v2605_v18, 0.0 }
 0xd65   :  { %1391 = vrot.lane.b32.xlu1 %v3199_v3, %s2665_s29 }
 0xd6e   :  { %1395 = vrot.lane.b32.xlu0 %v3193_v63, %s2665_s29 }
 0xd89   :  { %1367 = vadd.xlane.f32.xlu1 %v1366_v17 }
 0xd8d   :  { %1361 = vadd.xlane.f32.xlu1 %v1360_v2 }
 0xd9e   :  { %1389 = vrot.lane.b32.xlu1 %v3171_v48, %s2665_s29 }
 0xdd1   :  { %v1353_v3 = vpop.xlane.xlu0 %1352 }
 0xdd5   :  { %v1356_v19 = vpop.xlane.xlu1 %1355  ;;  %v1347_v63 = vpop.xlane.xlu0 %1346 }
 0xdd6   :  { %2606 = vrcp.f32 %v1347_v63 }
 0xdd9   :  { %v1350_v20 = vpop.xlane.xlu1 %1349 }
 0xdda   :  { %2608 = vrcp.f32 %v1350_v20 }
 0xddb   :  { %2610 = vrcp.f32 %v1356_v19 }
 0xddc   :  { %2612 = vrcp.f32 %v1353_v3 }
 0xddd   :  { %v1365_v21 = vpop.xlane.xlu0 %1364  ;;  %v1394_v25 = vpop.permute.xlu1 %1393 }
 0xde1   :  { %v1359_v22 = vpop.xlane.xlu0 %1358  ;;  %v1392_v31 = vpop.permute.xlu1 %1391 }
 0xde3   :  { %v2607_v24 = vpop.eup %2606 }
 0xde4   :  { %v1377_v30 = vmul.f32 %v2607_v24, %v2593_v23 }
 0xde5   :  { %v1396_v28 = vpop.permute.xlu0 %1395 }
 0xde6   :  { %2411 = vmatprep.subr.bf16.mxu1 %v1396_v28 }
 0xde7   :  { %v2609_v37 = vpop.eup %2608  ;;  %2412 = vmatpush3.bf16.msra.mxu1 %v1396_v28 }
 0xde8   :  { %v1378_v38 = vmul.f32 %v2609_v37, %v2597_v0  ;;  %2413 = vmatprep.subr.bf16.mxu1 %v1394_v25  ;;  %v2611_v43 = vpop.eup %2610 }
 0xde9   :  { %v2613_v32 = vpop.eup %2612  ;;  %v1380_v33 = vmul.f32 %v2611_v43, %v3244_v59 }
 0xdea   :  { %v1385_v29 = vpack.c.bf16 %v1378_v38, %v1377_v30  ;;  %v1379_v55 = vmul.f32 %v2613_v32, %v3240_v27 }
 0xdeb   :  { %2414 = vmatpush3.bf16.msra.mxu1 %v1394_v25 }
 0xdec   :  { %2419 = vmatprep.mubr.msk.bf16.mxu1 %vm423_vm5, %v1385_v29  ;;  %2415 = vmatprep.subr.bf16.mxu1 %v1392_v31  ;;  %v1386_v35 = vpack.c.bf16 %v1380_v33, %v1379_v55 }
 0xdef   :  { %2416 = vmatpush3.bf16.msra.mxu1 %v1392_v31 }
 0xe12   :  { %v1368_v48 = vpop.xlane.xlu1 %1367 }
 0xe13   :  { %2614 = vrcp.f32 %v1368_v48 }
 0xe14   :  { %2616 = vrcp.f32 %v1359_v22  ;;  %v2529_v22 = vld [vmem:[%s3419_s10 + $0x10] sm:$0xff]  }
 0xe15   :  { %2618 = vrcp.f32 %v1365_v21 }
 0xe16   :  { %v1362_v47 = vpop.xlane.xlu1 %1361 }
 0xe17   :  { %2620 = vrcp.f32 %v1362_v47 }
 0xe1a   :  { %v1390_v34 = vpop.permute.xlu1 %1389 }
 0xe1b   :  { %2417 = vmatprep.subr.bf16.mxu1 %v1390_v34 }
 0xe1c   :  { %2418 = vmatpush3.bf16.msra.mxu1 %v1390_v34 }
 0xe1d   :  { %2427 = vmatprep.subr.bf16.mxu1 %v2660_v8 }
 0xe1f   :  { %2420 = vmatmul.mubr.msk.bf16.vlgmr.msra.gmra.mxu1 %vm423_vm5, %v1386_v35 }
 0xe20   :  { %v2615_v36 = vpop.eup %2614  ;;  %2428 = vmatpush3.bf16.msra.mxu1 %v2526_v51 }
 0xe21   :  { %v2617_v39 = vpop.eup %2616  ;;  %v1384_v60 = vmul.f32 %v2615_v36, %v2603_v16  ;;  %2429 = vmatprep.subr.bf16.mxu1 %v2660_v8 }
 0xe22   :  { %v2619_v57 = vpop.eup %2618  ;;  %v1381_v42 = vmul.f32 %v2617_v39, %v3254_v41 }
 0xe23   :  { %v1383_v45 = vmul.f32 %v2619_v57, %v3250_v5  ;;  %v2138_v57 = vld [vmem:[%s3417_s8 + $0x1] ss:$0 sm:$0xff] }
 0xe24   :  { %v2621_v40 = vpop.eup %2620  ;;  %2430 = vmatpush3.bf16.msra.mxu1 %v2527_v56  ;;  %v2533_v56 = vld [vmem:[%s3421_s12 + $0x60] sm:$0xff]  }
 0xe25   :  { %v1382_v61 = vmul.f32 %v2621_v40, %v2605_v18  ;;  %v1388_v49 = vpack.c.bf16 %v1384_v60, %v1383_v45  ;;  %2443 = vmatprep.subr.bf16.mxu1 %v2660_v8  ;;  %v2139_v45 = vld [vmem:[%s3418_s9 + $0x1] ss:$0 sm:$0xff] }
 0xe27   :  { %v1387_v46 = vpack.c.bf16 %v1382_v61, %v1381_v42 }
 0xe29   :  { %2423 = vmatprep.mubr.msk.bf16.mxu1 %vm423_vm5, %v1387_v46 }
 0xe2a   :  { %2424 = vmatmul.mubr.msk.bf16.gmra.mxu1 %vm423_vm5, %v1388_v49 }
 0xe2b   :  { %2431 = vmatprep.mubr.msk.bf16.mxu1 %vm2667_vm6, %v2660_v8 }
 0xedf   :  { %v2421_v50 = vpop.f32.mrf.mxu1 }
 0xee0   :  { %1482 = vrot.lane.b32.xlu0 %v2421_v50, %s2666_s25 }
 0xee1   :  { %v1447_v52 = vpop.f32.mrf.mxu1 }
 0xee2   :  { %1478 = vst.msk [vmem:[#allocation3] sm:$0xff] %vm333_vm4, %v1447_v52  ;;  %v2530_v52 = vld [vmem:[%s3421_s12 + $0x78] sm:$0xff]  }
 0xee3   :  { %v2422_v53 = vpop.f32.mrf.mxu1 }
 0xee4   :  { %1484 = vrot.lane.b32.xlu1 %v2422_v53, %s2666_s25  ;;  %v2531_v53 = vld [vmem:[%s3421_s12 + $0x70] sm:$0xff]  }
 0xee5   :  { %v1450_v54 = vpop.f32.mrf.mxu1 }
 0xee6   :  { %1479 = vst.msk [vmem:[#allocation3 + $0x8] sm:$0xff] %vm333_vm4, %v1450_v54  ;;  %v2532_v54 = vld [vmem:[%s3421_s12 + $0x68] sm:$0xff]  }
 0xeea   :  { %v2425_v26 = vpop.f32.mrf.mxu1 }
 0xeec   :  { %v1463_v27 = vpop.f32.mrf.mxu1 }
 0xeed   :  { %1492 = vrot.lane.b32.xlu0 %v1463_v27, %s3447_s30  ;;  %v2535_v27 = vld [vmem:[%s3421_s12 + $0x50] sm:$0xff]  }
 0xeee   :  { %v2426_v58 = vpop.f32.mrf.mxu1 }
 0xef0   :  { %v1466_v23 = vpop.f32.mrf.mxu1 }
 0xef1   :  { %1502 = vrot.lane.b32.xlu0 %v2425_v26, %s3448_s24  ;;  %1494 = vrot.lane.b32.xlu1 %v1466_v23, %s3447_s30  ;;  %v2534_v26 = vld [vmem:[%s3421_s12 + $0x58] sm:$0xff]   ;;  %v2537_v23 = vld [vmem:[%s3421_s12 + $0x40] sm:$0xff]  }
 0xef5   :  { %1504 = vrot.lane.b32.xlu1 %v2426_v58, %s3448_s24  ;;  %v2536_v58 = vld [vmem:[%s3421_s12 + $0x48] sm:$0xff]  }
 0xf52   :  { %v1483_v59 = vpop.permute.xlu0 %1482 }
 0xf53   :  { %1488 = vst.msk [vmem:[#allocation3] sm:$0xff] %vm615_vm7, %v1483_v59  ;;  %v2145_v59 = vld [vmem:[%s3420_s11 + $0x1] ss:$0 sm:$0xff] }
 0xf56   :  { %v1485_v62 = vpop.permute.xlu1 %1484 }
 0xf57   :  { %1489 = vst.msk [vmem:[#allocation3 + $0x8] sm:$0xff] %vm615_vm7, %v1485_v62 }
 0xf5f   :  { %v1493_v0 = vpop.permute.xlu0 %1492 }
 0xf60   :  { %1498 = vst.msk [vmem:[#allocation3] sm:$0xff] %vm626_vm8, %v1493_v0 }
 0xf63   :  { %v1503_v1 = vpop.permute.xlu0 %1502  ;;  %v1495_v4 = vpop.permute.xlu1 %1494 }
 0xf64   :  { %1508 = vst.msk [vmem:[#allocation3] sm:$0xff] %vm637_vm9, %v1503_v1 }
 0xf65   :  { %1499 = vst.msk [vmem:[#allocation3 + $0x8] sm:$0xff] %vm626_vm8, %v1495_v4 }
 0xf67   :  { %v1505_v5 = vpop.permute.xlu1 %1504 }
 0xf68   :  { %1509 = vst.msk [vmem:[#allocation3 + $0x8] sm:$0xff] %vm637_vm9, %v1505_v5 }
 0xf6b   :  { %v1510_v6 = vld [vmem:[#allocation3] sm:$0xff] }
 0xf6f   :  { %v1511_v41 = vld [vmem:[#allocation3 + $0x8] sm:$0xff] }
 0xf70   :  { %v1512_v9 = vpack.c.bf16 %v1511_v41, %v1510_v6 }
 0xf72   :  { %2432 = vmatmul.mubr.msk.bf16.vlgmr.msra.gmra.mxu1 %vm71_vm0, %v1512_v9 }
 0xf73   :  { %2459 = vmatprep.mubr.msk.bf16.mxu1 %vm2667_vm6, %v2660_v8  ;;  %2444 = vmatpush3.bf16.msra.mxu1 %v2530_v52 }
 0xf74   :  { %2445 = vmatprep.subr.bf16.mxu1 %v2660_v8 }
 0xf77   :  { %2446 = vmatpush3.bf16.msra.mxu1 %v2531_v53 }
 0xf78   :  { %2447 = vmatprep.subr.bf16.mxu1 %v2660_v8 }
 0xf7b   :  { %2448 = vmatpush3.bf16.msra.mxu1 %v2532_v54 }
 0xf7c   :  { %2449 = vmatprep.subr.bf16.mxu1 %v2660_v8 }
 0xf7f   :  { %2450 = vmatpush3.bf16.msra.mxu1 %v2533_v56 }
 0xf80   :  { %2451 = vmatprep.subr.bf16.mxu1 %v2660_v8 }
 0xf83   :  { %2452 = vmatpush3.bf16.msra.mxu1 %v2534_v26 }
 0xf84   :  { %2453 = vmatprep.subr.bf16.mxu1 %v2660_v8 }
 0xf87   :  { %2454 = vmatpush3.bf16.msra.mxu1 %v2535_v27 }
 0xf88   :  { %2455 = vmatprep.subr.bf16.mxu1 %v2660_v8 }
 0xf8b   :  { %2456 = vmatpush3.bf16.msra.mxu1 %v2536_v58 }
 0xf8c   :  { %2457 = vmatprep.subr.bf16.mxu1 %v2660_v8 }
 0xf8f   :  { %2458 = vmatpush3.bf16.msra.mxu1 %v2537_v23  ;;  %v2177_v23 = vld [vmem:[%s3423_s14 + $0x1] ss:$0 sm:$0xff] }
0x1032   :  { %v1575_v10 = vpop.f32.mrf.mxu1 }
0x1033   :  { %v1576_v12 = vadd.f32 %v2132_v7, %v1575_v10 }
0x1034   :  { %v2433_v13 = vpop.f32.mrf.mxu1 }
0x1035   :  { %v1582_v14 = vadd.f32 %v1576_v12, %v3139_v44  ;;  %v2528_v44 = vld [vmem:[%s3419_s10 + $0x18] sm:$0xff]  }
0x1036   :  { %v1578_v15 = vpop.f32.mrf.mxu1  ;;  %2436 = vmatpush3.bf16.msra.mxu0 %v2528_v44 }
0x1037   :  { %v1579_v16 = vadd.f32 %v2132_v7, %v1578_v15  ;;  %v1588_v17 = vsel %vm71_vm0, %v1582_v14, 0.0  ;;  %v1596_v18 = vmul.f32 %v1582_v14, %v1582_v14  ;;  %2437 = vmatprep.subr.bf16.mxu0 %v2660_v8 }
0x1038   :  { %1589 = vadd.xlane.f32.xlu0 %v1588_v17  ;;  %v2434_v2 = vpop.f32.mrf.mxu1 }
0x1039   :  { %v1583_v3 = vadd.f32 %v1579_v16, %v3147_v11  ;;  %v1598_v19 = vsel %vm71_vm0, %v1596_v18, 0.0 }
0x103a   :  { %2438 = vmatpush3.bf16.msra.mxu0 %v2529_v22 }
0x103b   :  { %v1591_v63 = vsel %vm71_vm0, %v1583_v3, 0.0  ;;  %v1597_v20 = vmul.f32 %v1583_v3, %v1583_v3  ;;  %2463 = vmatprep.subr.bf16.mxu0 %v2660_v8 }
0x103c   :  { %1599 = vadd.xlane.f32.xlu0 %v1598_v19  ;;  %1592 = vadd.xlane.f32.xlu1 %v1591_v63 }
0x103d   :  { %v1601_v21 = vsel %vm71_vm0, %v1597_v20, 0.0 }
0x1040   :  { %1602 = vadd.xlane.f32.xlu0 %v1601_v21 }
0x10c1   :  { %v1590_v11 = vpop.xlane.xlu0 %1589 }
0x10c2   :  { %v1594_v24 = vmul.f32 0.03125, %v1590_v11  ;;  %v2166_v11 = vld [vmem:[%s3422_s13 + $0x1] ss:$0 sm:$0xff] }
0x10c4   :  { %v1606_v37 = vmul.f32 %v1594_v24, %v1594_v24  ;;  %v1612_v35 = vsub.f32 %v1582_v14, %v1594_v24 }
0x10c5   :  { %v1600_v25 = vpop.xlane.xlu0 %1599  ;;  %v1593_v28 = vpop.xlane.xlu1 %1592 }
0x10c6   :  { %v1604_v30 = vmul.f32 0.03125, %v1600_v25  ;;  %v1595_v38 = vmul.f32 0.03125, %v1593_v28 }
0x10c8   :  { %v1608_v29 = vsub.f32 %v1604_v30, %v1606_v37  ;;  %v1607_v43 = vmul.f32 %v1595_v38, %v1595_v38  ;;  %v1613_v40 = vsub.f32 %v1583_v3, %v1595_v38 }
0x10c9   :  { %v1603_v31 = vpop.xlane.xlu0 %1602 }
0x10ca   :  { %v1610_v48 = vmax.f32 %v1608_v29, 0.0  ;;  %v1605_v47 = vmul.f32 0.03125, %v1603_v31 }
0x10cc   :  { %v1614_v32 = vadd.f32 1e-12, %v1610_v48  ;;  %v1609_v33 = vsub.f32 %v1605_v47, %v1607_v43 }
0x10ce   :  { %2622 = vrsqrt.f32 %v1614_v32  ;;  %v1611_v34 = vmax.f32 %v1609_v33, 0.0 }
0x10d0   :  { %v1615_v55 = vadd.f32 1e-12, %v1611_v34 }
0x10d2   :  { %2624 = vrsqrt.f32 %v1615_v55  ;;  %v2538_v55 = vld [vmem:[%s3425_s16 + $0x8] sm:$0xff]  }
0x10db   :  { %v2623_v36 = vpop.eup %2622 }
0x10dc   :  { %v1618_v39 = vmul.f32 %v2623_v36, %v1612_v35  ;;  %v2539_v35 = vld [vmem:[%s3425_s16] sm:$0xff]  }
0x10de   :  { %v1626_v42 = vmul.f32 %v2138_v57, %v1618_v39 }
0x10df   :  { %v2625_v60 = vpop.eup %2624 }
0x10e0   :  { %v1619_v61 = vmul.f32 %v2625_v60, %v1613_v40  ;;  %v1634_v49 = vadd.f32 %v2139_v45, %v1626_v42 }
0x10e2   :  { %v1627_v46 = vmul.f32 %v2138_v57, %v1619_v61 }
0x10e4   :  { %v3327_v50 = vadd.f32 %v2139_v45, %v1627_v46 }
0x10e6   :  { %v1636_v51 = vpack.c.bf16 %v3327_v50, %v1634_v49 }
0x10e8   :  { %2440 = vmatmul.mubr.msk.bf16.vlgmr.msra.gmra.mxu0 %vm71_vm0, %v1636_v51 }
0x10e9   :  { %2467 = vmatprep.mubr.msk.bf16.mxu0 %vm2667_vm6, %v2660_v8  ;;  %2464 = vmatpush3.bf16.msra.mxu0 %v2538_v55 }
0x10ea   :  { %2465 = vmatprep.subr.bf16.mxu0 %v2660_v8 }
0x10ed   :  { %2466 = vmatpush3.bf16.msra.mxu0 %v2539_v35 }
0x10ee   :  { %2471 = vmatprep.subr.bf16.mxu0 %v2660_v8 }
0x11a8   :  { %v1699_v62 = vpop.f32.mrf.mxu0 }
0x11a9   :  { %v1700_v0 = vadd.f32 %v2145_v59, %v1699_v62 }
0x11aa   :  { %v2441_v1 = vpop.f32.mrf.mxu0 }
0x11ab   :  { %v1708_v4 = vmul.f32 0.044715, %v1700_v0  ;;  %v1706_v19 = vmul.f32 0.5, %v1700_v0 }
0x11ac   :  { %v1702_v5 = vpop.f32.mrf.mxu0 }
0x11ad   :  { %v1710_v6 = vmul.f32 %v1708_v4, %v1700_v0  ;;  %v1703_v41 = vadd.f32 %v2145_v59, %v1702_v5  ;;  %v2178_v4 = vld [vmem:[%s3424_s15 + $0x1] ss:$0 sm:$0xff] }
0x11ae   :  { %v2442_v9 = vpop.f32.mrf.mxu0 }
0x11af   :  { %v1712_v7 = vmul.f32 %v1710_v6, %v1700_v0  ;;  %v1709_v10 = vmul.f32 0.044715, %v1703_v41  ;;  %v1707_v63 = vmul.f32 0.5, %v1703_v41 }
0x11b1   :  { %v1714_v12 = vadd.f32 %v1712_v7, %v1700_v0  ;;  %v1711_v13 = vmul.f32 %v1709_v10, %v1703_v41  ;;  %v2540_v7 = vld [vmem:[%s3427_s18 + $0x8] sm:$0xff]   ;;  %v2541_v10 = vld [vmem:[%s3427_s18] sm:$0xff]  }
0x11b3   :  { %v1716_v14 = vmul.f32 0.7978845, %v1714_v12  ;;  %v1713_v15 = vmul.f32 %v1711_v13, %v1703_v41  ;;  %v2179_v12 = vld [vmem:[%s3426_s17] ss:$0 sm:$0xff]  ;;  %s2670_s17 = smov [#allocation4]  }
0x11b4   :  { %s2040_s4 = sshll.u32 %s2670_s17, 4  ;;  %s2041_s4 = int_to_ptr.vmem [resolvable:$true] %s2040_s4 }
0x11b5   :  { %2626 = vtanh.f32 %v1716_v14  ;;  %v1715_v16 = vadd.f32 %v1713_v15, %v1703_v41  ;;  %s2638_s30 = scalar_lea.vmem %s2041_s4, 32  ;;  %p2643_p1 = scmp.lt.s32.totalorder %s2041_s4, %s2041_s4 }
0x11b6   :  { %p2639_p0 = scmp.ne.s32.totalorder %s2041_s4, %s2638_s30  ;;  %p2644_p2 = scmp.lt.s32.totalorder %s2638_s30, %s2638_s30 }
0x11b7   :  { %v1717_v17 = vmul.f32 0.7978845, %v1715_v16 }
0x11b8   :  { %p2645_p3 = por %p2644_p2, %p2643_p1 }
0x11b9   :  { %2628 = vtanh.f32 %v1717_v17 }
0x11ba   :  { %p2646_p4 = pnand %p2645_p3, %p2639_p0 }
0x11c2   :  { %v2627_v18 = vpop.eup %2626 }
0x11c3   :  { %v1720_v2 = vadd.f32 1.0, %v2627_v18 }
0x11c5   :  { %v1722_v21 = vmul.f32 %v1720_v2, %v1706_v19 }
0x11c6   :  { %v2629_v3 = vpop.eup %2628 }
0x11c7   :  { %v1721_v20 = vadd.f32 1.0, %v2629_v3 }
0x11c9   :  { %v1723_v44 = vmul.f32 %v1721_v20, %v1707_v63 }
0x11cb   :  { %v1724_v22 = vpack.c.bf16 %v1723_v44, %v1722_v21 }
0x11cd   :  { %2460 = vmatmul.mubr.bf16.vlgmr.msra.gmra.mxu1 %v1724_v22 }
0x128d   :  { %v1832_v24 = vpop.f32.mrf.mxu1 }
0x128e   :  { %v1833_v25 = vadd.f32 %v2166_v11, %v1832_v24 }
0x128f   :  { %v2461_v28 = vpop.f32.mrf.mxu1 }
0x1290   :  { %v1839_v37 = vadd.f32 %v1833_v25, %v1634_v49 }
0x1291   :  { %v1835_v30 = vpop.f32.mrf.mxu1 }
0x1292   :  { %v1836_v38 = vadd.f32 %v2166_v11, %v1835_v30  ;;  %v1845_v29 = vsel %vm71_vm0, %v1839_v37, 0.0  ;;  %v1853_v31 = vmul.f32 %v1839_v37, %v1839_v37 }
0x1293   :  { %1846 = vadd.xlane.f32.xlu0 %v1845_v29  ;;  %v2462_v48 = vpop.f32.mrf.mxu1 }
0x1294   :  { %v1840_v43 = vadd.f32 %v1836_v38, %v3327_v50  ;;  %v1855_v47 = vsel %vm71_vm0, %v1853_v31, 0.0 }
0x1296   :  { %v1848_v32 = vsel %vm71_vm0, %v1840_v43, 0.0  ;;  %v1854_v33 = vmul.f32 %v1840_v43, %v1840_v43 }
0x1297   :  { %1856 = vadd.xlane.f32.xlu0 %v1855_v47  ;;  %1849 = vadd.xlane.f32.xlu1 %v1848_v32 }
0x1298   :  { %v1858_v34 = vsel %vm71_vm0, %v1854_v33, 0.0 }
0x129b   :  { %1859 = vadd.xlane.f32.xlu1 %v1858_v34 }
0x131c   :  { %v1847_v36 = vpop.xlane.xlu0 %1846 }
0x131d   :  { %v1851_v39 = vmul.f32 0.03125, %v1847_v36 }
0x131f   :  { %v1863_v60 = vmul.f32 %v1851_v39, %v1851_v39  ;;  %v1869_v26 = vsub.f32 %v1839_v37, %v1851_v39 }
0x1320   :  { %v1857_v57 = vpop.xlane.xlu0 %1856  ;;  %v1850_v40 = vpop.xlane.xlu1 %1849 }
0x1321   :  { %v1861_v42 = vmul.f32 0.03125, %v1857_v57  ;;  %v1852_v61 = vmul.f32 0.03125, %v1850_v40 }
0x1323   :  { %v1865_v45 = vsub.f32 %v1861_v42, %v1863_v60  ;;  %v1864_v50 = vmul.f32 %v1852_v61, %v1852_v61  ;;  %v1870_v59 = vsub.f32 %v1840_v43, %v1852_v61 }
0x1324   :  { %v1860_v46 = vpop.xlane.xlu1 %1859 }
0x1325   :  { %v1867_v49 = vmax.f32 %v1865_v45, 0.0  ;;  %v1862_v51 = vmul.f32 0.03125, %v1860_v46 }
0x1327   :  { %v1871_v52 = vadd.f32 1e-12, %v1867_v49  ;;  %v1866_v53 = vsub.f32 %v1862_v51, %v1864_v50 }
0x1329   :  { %2630 = vrsqrt.f32 %v1871_v52  ;;  %v1868_v54 = vmax.f32 %v1866_v53, 0.0 }
0x132b   :  { %v1872_v56 = vadd.f32 1e-12, %v1868_v54 }
0x132d   :  { %2632 = vrsqrt.f32 %v1872_v56 }
0x1336   :  { %v2631_v27 = vpop.eup %2630 }
0x1337   :  { %v1875_v58 = vmul.f32 %v2631_v27, %v1869_v26 }
0x1339   :  { %v1883_v1 = vmul.f32 %v2177_v23, %v1875_v58 }
0x133a   :  { %v2633_v62 = vpop.eup %2632 }
0x133b   :  { %v1876_v0 = vmul.f32 %v2633_v62, %v1870_v59  ;;  %v1891_v6 = vadd.f32 %v2178_v4, %v1883_v1 }
0x133d   :  { %v1884_v5 = vmul.f32 %v2177_v23, %v1876_v0 }
0x133f   :  { %v1892_v41 = vadd.f32 %v2178_v4, %v1884_v5 }
0x1341   :  { %v1893_v9 = vpack.c.bf16 %v1892_v41, %v1891_v6 }
0x1343   :  { %2468 = vmatmul.mubr.msk.bf16.vlgmr.msra.gmra.mxu0 %vm71_vm0, %v1893_v9 }
0x1344   :  { %2475 = vmatprep.mubr.msk.bf16.mxu0 %vm2667_vm6, %v2660_v8  ;;  %2472 = vmatpush3.bf16.msra.mxu0 %v2540_v7 }
0x1345   :  { %2473 = vmatprep.subr.bf16.mxu0 %v2660_v8  ;;  %v2183_v8 = vld [vmem:[%s3428_s19] ss:$0 sm:$0xff] }
0x1348   :  { %2474 = vmatpush3.bf16.msra.mxu0 %v2541_v10 }
0x1403   :  { %v1954_v13 = vpop.f32.mrf.mxu0 }
0x1404   :  { %v1955_v14 = vadd.f32 %v2179_v12, %v1954_v13 }
0x1405   :  { %v2469_v15 = vpop.f32.mrf.mxu0 }
0x1406   :  { %2634 = vtanh.f32 %v1955_v14 }
0x1407   :  { %v1957_v16 = vpop.f32.mrf.mxu0 }
0x1408   :  { %v1958_v17 = vadd.f32 %v2179_v12, %v1957_v16 }
0x1409   :  { %v2470_v18 = vpop.f32.mrf.mxu0 }
0x140a   :  { %2636 = vtanh.f32 %v1958_v17 }
0x1413   :  { %v2635_v2 = vpop.eup %2634 }
0x1417   :  { %v2637_v3 = vpop.eup %2636 }
0x1418   :  { %v1963_v19 = vpack.c.bf16 %v2637_v3, %v2635_v2 }
0x141a   :  { %2476 = vmatmul.mubr.msk.bf16.vlgmr.msra.gmra.mxu0 %vm71_vm0, %v1963_v19 }
0x14da   :  { %v2024_v63 = vpop.f32.mrf.mxu0 }
0x14db   :  { %v2025_v20 = vadd.f32 %v2183_v8, %v2024_v63 }
0x14dc   :  { %v2477_v21 = vpop.f32.mrf.mxu0 }
0x14dd   :  { %2032 = vst.msk [vmem:[#allocation4] sm:$0x1] %vm2031_vm10, %v2025_v20 }
0x14de   :  { %v2027_v44 = vpop.f32.mrf.mxu0 }
0x14df   :  { %v2028_v22 = vadd.f32 %v2183_v8, %v2027_v44 }
0x14e0   :  { %v2478_v11 = vpop.f32.mrf.mxu0 }
0x14e1   :  { %2033 = vst.msk [vmem:[#allocation4 + $0x1] sm:$0x1] %vm2031_vm10, %v2028_v22 }
0x14e2   :  { %2649 = shalt.err (!%p2646_p4)
}
0x14e3   :  { %2043 = dma.vmem_to_hbm [thread:$0]  %s2041_s4, 32, %s3429_s20, [#allocation5]  }
0x14e4   :  { %2658 = dma.done.wait [#allocation5], 32  }
0x14e5   :  { %2659 = vsyncadd [#allocation5], 4294967264 }
0x14e6   :  { %2047 = vsyncpa [#allocation5], 1 }

</bundles_post_ra>
